<compile_context>
chip_gen: v5e
topology: v5e:2x2
jax: 0.10.0
libtpu: 0.0.40
codegen_flags: <defaults>
</compile_context>

<pallas_src>
import functools

import jax
import jax.numpy as jnp
from jax.experimental import pallas as pl
from jax.experimental.pallas import tpu as pltpu


def _stage1_encode_sample_kernel(x_ref, w1_ref, b1_ref, wh_ref, bh_ref, eps_ref, z_ref,
                                 *, row_tile, wp, latent):
    # x_ref:   (Lp, C)            f32  -- whole zero-padded image of batch b, rows flattened
    # w1_ref:  (9, C, hidden)     bf16 -- 3x3 conv weights, tap-major
    # b1_ref:  (1, hidden)        f32
    # wh_ref:  (hidden, 2*latent) bf16 -- [Wmu | 0.5*Wlv] fused heads
    # bh_ref:  (1, 2*latent)      f32  -- [bmu | 0.5*blv]
    # eps_ref: (rows, latent)     bf16
    # z_ref:   (rows, latent)     f32
    rows = row_tile * wp
    hidden = w1_ref.shape[-1]
    base = pl.program_id(1) * rows          # flat offset of this row-chunk's output pixels

    # 3x3 conv as 9 shifted matmuls over the VMEM-resident padded image (in-kernel im2col).
    acc = jnp.zeros((rows, hidden), jnp.float32)
    for i in range(3):
        for j in range(3):
            tap = x_ref[pl.ds(base + i * wp + j, rows), :]          # (rows, C) f32
            acc = acc + jnp.dot(tap.astype(jnp.bfloat16), w1_ref[i * 3 + j],
                                preferred_element_type=jnp.float32)
    h = jnp.maximum(acc + b1_ref[...], 0.0)                          # bias + ReLU (f32)

    # Fused mu/logvar heads in one MXU push; 0.5 already folded into the logvar half.
    heads = jnp.dot(h.astype(jnp.bfloat16), wh_ref[...],
                    preferred_element_type=jnp.float32) + bh_ref[...]  # (rows, 2*latent)
    z_mu = heads[:, :latent]
    z_sigma = jnp.exp(heads[:, latent:])                             # EUP exp

    # Reparameterization: z = mu + eps * sigma
    z_ref[...] = (z_mu + eps_ref[...] * z_sigma).astype(z_ref.dtype)


def stage1_wrapper_forward(x_nchw, params, eps, *, row_tile=None):
    """Pallas-backed Stage1Wrapper.forward. x: (B,C,H,W) NCHW; eps: (B,H,W,latent).
    Returns z in NCHW: (B, latent, H, W)."""
    W1, b1, Wmu, bmu, Wlv, blv = params
    B, C, H, Wd = x_nchw.shape
    Wp = Wd + 2                       # padded width (also output "pitch"; 2 junk cols/row)
    hidden = W1.shape[-1]
    latent = Wmu.shape[-1]

    # Row-chunk size: largest divisor of H keeping the M-tile (row_tile*Wp) <= 2048 rows.
    if row_tile is None:
        row_tile = 1
        for cand in range(1, H + 1):
            if H % cand == 0 and cand * Wp <= 2048:
                row_tile = cand
    assert H % row_tile == 0, "row_tile must divide H"
    n_row_tiles = H // row_tile
    rows = row_tile * Wp              # output pixels (incl. junk cols) per grid step

    # --- glue (wrapper side): NCHW -> NHWC, zero-pad, flatten (row, col) -> one axis ---
    x = jnp.transpose(x_nchw, (0, 2, 3, 1))                      # (B, H, W, C)
    xp = jnp.pad(x, ((0, 0), (1, 1), (1, 1), (0, 0)))            # (B, H+2, Wp, C)
    xflat = xp.reshape(B, (H + 2) * Wp, C)
    lp = (((H + 2) * Wp + 2) + 7) // 8 * 8                       # +2 tail rows for last tap
    xflat = jnp.pad(xflat, ((0, 0), (0, lp - (H + 2) * Wp), (0, 0)))  # f32

    # Conv weights HWIO (3,3,C,hidden) -> tap-major (9, C, hidden); fuse heads, fold 0.5.
    w1 = W1.reshape(9, C, hidden).astype(jnp.bfloat16)
    wh = jnp.concatenate([Wmu, 0.5 * Wlv], axis=1).astype(jnp.bfloat16)   # (hidden, 2*latent)
    bh = jnp.concatenate([bmu, 0.5 * blv], axis=1).astype(jnp.float32)    # (1, 2*latent)
    b1f = b1.astype(jnp.float32)

    # eps laid out on the padded-width grid (junk cols get zeros, their z is discarded).
    m_pad = H * Wp
    eps_flat = jnp.pad(eps, ((0, 0), (0, 0), (0, 2), (0, 0))) \
                  .reshape(B, m_pad, latent).astype(jnp.bfloat16)

    kernel = functools.partial(_stage1_encode_sample_kernel,
                               row_tile=row_tile, wp=Wp, latent=latent)

    z_pad = pl.pallas_call(
        kernel,
        out_shape=jax.ShapeDtypeStruct((B, m_pad, latent), jnp.float32),
        grid=(B, n_row_tiles),
        in_specs=[
            # padded image of batch b: stays VMEM-resident across the row-chunk axis
            pl.BlockSpec((None, lp, C), lambda b, t: (b, 0, 0)),
            pl.BlockSpec((9, C, hidden), lambda b, t: (0, 0, 0)),
            pl.BlockSpec((1, hidden), lambda b, t: (0, 0)),
            pl.BlockSpec((hidden, 2 * latent), lambda b, t: (0, 0)),
            pl.BlockSpec((1, 2 * latent), lambda b, t: (0, 0)),
            pl.BlockSpec((None, rows, latent), lambda b, t: (b, t, 0)),
        ],
        out_specs=pl.BlockSpec((None, rows, latent), lambda b, t: (b, t, 0)),
        compiler_params=pltpu.CompilerParams(
            dimension_semantics=("parallel", "parallel"),
        ),
    )(xflat, w1, b1f, wh, bh, eps_flat)

    # Drop the 2 junk columns per row, go back to NCHW.
    z = z_pad.reshape(B, H, Wp, latent)[:, :, :Wd, :]
    return jnp.transpose(z, (0, 3, 1, 2))


def _reference_forward(x_nchw, params, eps):
    """Pure-JAX f32 reference of the same math (correctness check)."""
    W1, b1, Wmu, bmu, Wlv, blv = params
    B, C, H, Wd = x_nchw.shape
    hidden = W1.shape[-1]
    latent = Wmu.shape[-1]
    x = jnp.transpose(x_nchw, (0, 2, 3, 1))
    xp = jnp.pad(x, ((0, 0), (1, 1), (1, 1), (0, 0)))
    taps = [xp[:, i:i + H, j:j + Wd, :] for i in range(3) for j in range(3)]
    patches = jnp.concatenate(taps, axis=-1).reshape(B * H * Wd, 9 * C)
    h = jnp.maximum(patches @ W1.reshape(9 * C, hidden) + b1, 0.0)
    mu = h @ Wmu + bmu
    sigma = jnp.exp(0.5 * (h @ Wlv + blv))
    z = mu + eps.reshape(B * H * Wd, latent) * sigma
    return jnp.transpose(z.reshape(B, H, Wd, latent), (0, 3, 1, 2))


if __name__ == "__main__":
    # Small shapes consistent with a stage-1 VAE encode: B=2, Cin=4, H=W=16, hidden=32, latent=8.
    B, Cin, H, W = 2, 4, 16, 16
    hidden, latent = 32, 8

    key = jax.random.PRNGKey(0)
    kx, kw1, kb1, kwmu, kbmu, kwlv, kblv, keps = jax.random.split(key, 8)

    x = jax.random.normal(kx, (B, Cin, H, W), dtype=jnp.float32)          # NCHW, like PyTorch

    # Deterministic parameter init (HWIO conv weight; permute if loading real PyTorch OIHW weights).
    W1 = 0.1 * jax.random.normal(kw1, (3, 3, Cin, hidden), dtype=jnp.float32)
    b1 = 0.01 * jax.random.normal(kb1, (1, hidden), dtype=jnp.float32)
    Wmu = 0.1 * jax.random.normal(kwmu, (hidden, latent), dtype=jnp.float32)
    bmu = 0.01 * jax.random.normal(kbmu, (1, latent), dtype=jnp.float32)
    Wlv = 0.1 * jax.random.normal(kwlv, (hidden, latent), dtype=jnp.float32)
    blv = 0.01 * jax.random.normal(kblv, (1, latent), dtype=jnp.float32)
    params = (W1, b1, Wmu, bmu, Wlv, blv)

    # Deterministic reparameterization noise eps ~ N(0, 1) per output pixel (model.sampling).
    eps = jax.random.normal(keps, (B, H, W, latent), dtype=jnp.float32)

    # row_tile=8 -> grid (B, 2): exercises the pipelined row-chunk axis even at this tiny size.
    fwd = jax.jit(functools.partial(stage1_wrapper_forward, row_tile=8))
    z = fwd(x, params, eps)
    jax.block_until_ready(z)

    z_ref = _reference_forward(x, params, eps)
    assert z.shape == (B, latent, H, W)
    # bf16 MXU inputs / bf16 eps vs f32 reference -> loosened tolerance.
    assert jnp.allclose(z, z_ref, atol=5e-2, rtol=5e-2), "Pallas kernel mismatch vs reference"

    print("KERNEL_OK")
</pallas_src>

<mosaic_0001>
module attributes {stable_mosaic.version = 11 : i64} {
  func.func @_stage1_encode_sample_kernel(%arg0: i32, %arg1: i32, %arg2: memref<1x328x4xf32, #tpu.memory_space<vmem>>, %arg3: memref<9x4x32xbf16, #tpu.memory_space<vmem>>, %arg4: memref<1x32xf32, #tpu.memory_space<vmem>>, %arg5: memref<32x16xbf16, #tpu.memory_space<vmem>>, %arg6: memref<1x16xf32, #tpu.memory_space<vmem>>, %arg7: memref<1x144x8xbf16, #tpu.memory_space<vmem>>, %arg8: memref<1x144x8xf32, #tpu.memory_space<vmem>>) attributes {dimension_semantics = [#tpu.dimension_semantics<parallel>, #tpu.dimension_semantics<parallel>], iteration_bounds = array<i64: 2, 2>, scalar_prefetch = 0 : i64, scratch_operands = 0 : i64, tpu.core_type = #tpu.core_type<tc>, window_params = [{transform_indices = @transform_0, window_bounds = array<i64: 1, 328, 4>}, {pipeline_mode = #tpu.pipeline_mode<synchronous>, transform_indices = @transform_1, window_bounds = array<i64: 9, 4, 32>}, {pipeline_mode = #tpu.pipeline_mode<synchronous>, transform_indices = @transform_2, window_bounds = array<i64: 1, 32>}, {pipeline_mode = #tpu.pipeline_mode<synchronous>, transform_indices = @transform_3, window_bounds = array<i64: 32, 16>}, {pipeline_mode = #tpu.pipeline_mode<synchronous>, transform_indices = @transform_4, window_bounds = array<i64: 1, 16>}, {transform_indices = @transform_5, window_bounds = array<i64: 1, 144, 8>}, {transform_indices = @transform_6, window_bounds = array<i64: 1, 144, 8>}]} {
    %c144_i32 = arith.constant 144 : i32
    %0 = arith.muli %arg1, %c144_i32 : i32
    %cst = arith.constant 0.000000e+00 : f32
    %1 = vector.broadcast %cst : f32 to vector<144x32xf32>
    %c0_i32 = arith.constant 0 : i32
    %2 = arith.addi %0, %c0_i32 : i32
    %c0_i32_0 = arith.constant 0 : i32
    %3 = arith.addi %2, %c0_i32_0 : i32
    %c0 = arith.constant 0 : index
    %4 = arith.index_cast %3 : i32 to index
    %c0_1 = arith.constant 0 : index
    %5 = vector.load %arg2[%c0, %4, %c0_1] : memref<1x328x4xf32, #tpu.memory_space<vmem>>, vector<1x144x4xf32>
    %6 = vector.shape_cast %5 : vector<1x144x4xf32> to vector<144x4xf32>
    %7 = arith.truncf %6 : vector<144x4xf32> to vector<144x4xbf16>
    %c0_2 = arith.constant 0 : index
    %c0_3 = arith.constant 0 : index
    %c0_4 = arith.constant 0 : index
    %8 = vector.load %arg3[%c0_2, %c0_3, %c0_4] : memref<9x4x32xbf16, #tpu.memory_space<vmem>>, vector<1x4x32xbf16>
    %9 = vector.shape_cast %8 : vector<1x4x32xbf16> to vector<4x32xbf16>
    %cst_5 = arith.constant dense<0.000000e+00> : vector<144x32xf32>
    %10 = tpu.matmul %7, %9, %cst_5 {dimension_numbers = #tpu.dot_dimension_numbers<[1], [0], [0], [1], [0, 0, 1, 1], [], []>} : vector<144x4xbf16>, vector<4x32xbf16>, vector<144x32xf32> -> vector<144x32xf32>
    %11 = arith.addf %1, %10 : vector<144x32xf32>
    %c0_i32_6 = arith.constant 0 : i32
    %12 = arith.addi %0, %c0_i32_6 : i32
    %c1_i32 = arith.constant 1 : i32
    %13 = arith.addi %12, %c1_i32 : i32
    %c0_7 = arith.constant 0 : index
    %14 = arith.index_cast %13 : i32 to index
    %c0_8 = arith.constant 0 : index
    %15 = vector.load %arg2[%c0_7, %14, %c0_8] : memref<1x328x4xf32, #tpu.memory_space<vmem>>, vector<1x144x4xf32>
    %16 = vector.shape_cast %15 : vector<1x144x4xf32> to vector<144x4xf32>
    %17 = arith.truncf %16 : vector<144x4xf32> to vector<144x4xbf16>
    %c1 = arith.constant 1 : index
    %c0_9 = arith.constant 0 : index
    %c0_10 = arith.constant 0 : index
    %18 = vector.load %arg3[%c1, %c0_9, %c0_10] : memref<9x4x32xbf16, #tpu.memory_space<vmem>>, vector<1x4x32xbf16>
    %19 = vector.shape_cast %18 : vector<1x4x32xbf16> to vector<4x32xbf16>
    %cst_11 = arith.constant dense<0.000000e+00> : vector<144x32xf32>
    %20 = tpu.matmul %17, %19, %cst_11 {dimension_numbers = #tpu.dot_dimension_numbers<[1], [0], [0], [1], [0, 0, 1, 1], [], []>} : vector<144x4xbf16>, vector<4x32xbf16>, vector<144x32xf32> -> vector<144x32xf32>
    %21 = arith.addf %11, %20 : vector<144x32xf32>
    %c0_i32_12 = arith.constant 0 : i32
    %22 = arith.addi %0, %c0_i32_12 : i32
    %c2_i32 = arith.constant 2 : i32
    %23 = arith.addi %22, %c2_i32 : i32
    %c0_13 = arith.constant 0 : index
    %24 = arith.index_cast %23 : i32 to index
    %c0_14 = arith.constant 0 : index
    %25 = vector.load %arg2[%c0_13, %24, %c0_14] : memref<1x328x4xf32, #tpu.memory_space<vmem>>, vector<1x144x4xf32>
    %26 = vector.shape_cast %25 : vector<1x144x4xf32> to vector<144x4xf32>
    %27 = arith.truncf %26 : vector<144x4xf32> to vector<144x4xbf16>
    %c2 = arith.constant 2 : index
    %c0_15 = arith.constant 0 : index
    %c0_16 = arith.constant 0 : index
    %28 = vector.load %arg3[%c2, %c0_15, %c0_16] : memref<9x4x32xbf16, #tpu.memory_space<vmem>>, vector<1x4x32xbf16>
    %29 = vector.shape_cast %28 : vector<1x4x32xbf16> to vector<4x32xbf16>
    %cst_17 = arith.constant dense<0.000000e+00> : vector<144x32xf32>
    %30 = tpu.matmul %27, %29, %cst_17 {dimension_numbers = #tpu.dot_dimension_numbers<[1], [0], [0], [1], [0, 0, 1, 1], [], []>} : vector<144x4xbf16>, vector<4x32xbf16>, vector<144x32xf32> -> vector<144x32xf32>
    %31 = arith.addf %21, %30 : vector<144x32xf32>
    %c18_i32 = arith.constant 18 : i32
    %32 = arith.addi %0, %c18_i32 : i32
    %c0_i32_18 = arith.constant 0 : i32
    %33 = arith.addi %32, %c0_i32_18 : i32
    %c0_19 = arith.constant 0 : index
    %34 = arith.index_cast %33 : i32 to index
    %c0_20 = arith.constant 0 : index
    %35 = vector.load %arg2[%c0_19, %34, %c0_20] : memref<1x328x4xf32, #tpu.memory_space<vmem>>, vector<1x144x4xf32>
    %36 = vector.shape_cast %35 : vector<1x144x4xf32> to vector<144x4xf32>
    %37 = arith.truncf %36 : vector<144x4xf32> to vector<144x4xbf16>
    %c3 = arith.constant 3 : index
    %c0_21 = arith.constant 0 : index
    %c0_22 = arith.constant 0 : index
    %38 = vector.load %arg3[%c3, %c0_21, %c0_22] : memref<9x4x32xbf16, #tpu.memory_space<vmem>>, vector<1x4x32xbf16>
    %39 = vector.shape_cast %38 : vector<1x4x32xbf16> to vector<4x32xbf16>
    %cst_23 = arith.constant dense<0.000000e+00> : vector<144x32xf32>
    %40 = tpu.matmul %37, %39, %cst_23 {dimension_numbers = #tpu.dot_dimension_numbers<[1], [0], [0], [1], [0, 0, 1, 1], [], []>} : vector<144x4xbf16>, vector<4x32xbf16>, vector<144x32xf32> -> vector<144x32xf32>
    %41 = arith.addf %31, %40 : vector<144x32xf32>
    %c18_i32_24 = arith.constant 18 : i32
    %42 = arith.addi %0, %c18_i32_24 : i32
    %c1_i32_25 = arith.constant 1 : i32
    %43 = arith.addi %42, %c1_i32_25 : i32
    %c0_26 = arith.constant 0 : index
    %44 = arith.index_cast %43 : i32 to index
    %c0_27 = arith.constant 0 : index
    %45 = vector.load %arg2[%c0_26, %44, %c0_27] : memref<1x328x4xf32, #tpu.memory_space<vmem>>, vector<1x144x4xf32>
    %46 = vector.shape_cast %45 : vector<1x144x4xf32> to vector<144x4xf32>
    %47 = arith.truncf %46 : vector<144x4xf32> to vector<144x4xbf16>
    %c4 = arith.constant 4 : index
    %c0_28 = arith.constant 0 : index
    %c0_29 = arith.constant 0 : index
    %48 = vector.load %arg3[%c4, %c0_28, %c0_29] : memref<9x4x32xbf16, #tpu.memory_space<vmem>>, vector<1x4x32xbf16>
    %49 = vector.shape_cast %48 : vector<1x4x32xbf16> to vector<4x32xbf16>
    %cst_30 = arith.constant dense<0.000000e+00> : vector<144x32xf32>
    %50 = tpu.matmul %47, %49, %cst_30 {dimension_numbers = #tpu.dot_dimension_numbers<[1], [0], [0], [1], [0, 0, 1, 1], [], []>} : vector<144x4xbf16>, vector<4x32xbf16>, vector<144x32xf32> -> vector<144x32xf32>
    %51 = arith.addf %41, %50 : vector<144x32xf32>
    %c18_i32_31 = arith.constant 18 : i32
    %52 = arith.addi %0, %c18_i32_31 : i32
    %c2_i32_32 = arith.constant 2 : i32
    %53 = arith.addi %52, %c2_i32_32 : i32
    %c0_33 = arith.constant 0 : index
    %54 = arith.index_cast %53 : i32 to index
    %c0_34 = arith.constant 0 : index
    %55 = vector.load %arg2[%c0_33, %54, %c0_34] : memref<1x328x4xf32, #tpu.memory_space<vmem>>, vector<1x144x4xf32>
    %56 = vector.shape_cast %55 : vector<1x144x4xf32> to vector<144x4xf32>
    %57 = arith.truncf %56 : vector<144x4xf32> to vector<144x4xbf16>
    %c5 = arith.constant 5 : index
    %c0_35 = arith.constant 0 : index
    %c0_36 = arith.constant 0 : index
    %58 = vector.load %arg3[%c5, %c0_35, %c0_36] : memref<9x4x32xbf16, #tpu.memory_space<vmem>>, vector<1x4x32xbf16>
    %59 = vector.shape_cast %58 : vector<1x4x32xbf16> to vector<4x32xbf16>
    %cst_37 = arith.constant dense<0.000000e+00> : vector<144x32xf32>
    %60 = tpu.matmul %57, %59, %cst_37 {dimension_numbers = #tpu.dot_dimension_numbers<[1], [0], [0], [1], [0, 0, 1, 1], [], []>} : vector<144x4xbf16>, vector<4x32xbf16>, vector<144x32xf32> -> vector<144x32xf32>
    %61 = arith.addf %51, %60 : vector<144x32xf32>
    %c36_i32 = arith.constant 36 : i32
    %62 = arith.addi %0, %c36_i32 : i32
    %c0_i32_38 = arith.constant 0 : i32
    %63 = arith.addi %62, %c0_i32_38 : i32
    %c0_39 = arith.constant 0 : index
    %64 = arith.index_cast %63 : i32 to index
    %c0_40 = arith.constant 0 : index
    %65 = vector.load %arg2[%c0_39, %64, %c0_40] : memref<1x328x4xf32, #tpu.memory_space<vmem>>, vector<1x144x4xf32>
    %66 = vector.shape_cast %65 : vector<1x144x4xf32> to vector<144x4xf32>
    %67 = arith.truncf %66 : vector<144x4xf32> to vector<144x4xbf16>
    %c6 = arith.constant 6 : index
    %c0_41 = arith.constant 0 : index
    %c0_42 = arith.constant 0 : index
    %68 = vector.load %arg3[%c6, %c0_41, %c0_42] : memref<9x4x32xbf16, #tpu.memory_space<vmem>>, vector<1x4x32xbf16>
    %69 = vector.shape_cast %68 : vector<1x4x32xbf16> to vector<4x32xbf16>
    %cst_43 = arith.constant dense<0.000000e+00> : vector<144x32xf32>
    %70 = tpu.matmul %67, %69, %cst_43 {dimension_numbers = #tpu.dot_dimension_numbers<[1], [0], [0], [1], [0, 0, 1, 1], [], []>} : vector<144x4xbf16>, vector<4x32xbf16>, vector<144x32xf32> -> vector<144x32xf32>
    %71 = arith.addf %61, %70 : vector<144x32xf32>
    %c36_i32_44 = arith.constant 36 : i32
    %72 = arith.addi %0, %c36_i32_44 : i32
    %c1_i32_45 = arith.constant 1 : i32
    %73 = arith.addi %72, %c1_i32_45 : i32
    %c0_46 = arith.constant 0 : index
    %74 = arith.index_cast %73 : i32 to index
    %c0_47 = arith.constant 0 : index
    %75 = vector.load %arg2[%c0_46, %74, %c0_47] : memref<1x328x4xf32, #tpu.memory_space<vmem>>, vector<1x144x4xf32>
    %76 = vector.shape_cast %75 : vector<1x144x4xf32> to vector<144x4xf32>
    %77 = arith.truncf %76 : vector<144x4xf32> to vector<144x4xbf16>
    %c7 = arith.constant 7 : index
    %c0_48 = arith.constant 0 : index
    %c0_49 = arith.constant 0 : index
    %78 = vector.load %arg3[%c7, %c0_48, %c0_49] : memref<9x4x32xbf16, #tpu.memory_space<vmem>>, vector<1x4x32xbf16>
    %79 = vector.shape_cast %78 : vector<1x4x32xbf16> to vector<4x32xbf16>
    %cst_50 = arith.constant dense<0.000000e+00> : vector<144x32xf32>
    %80 = tpu.matmul %77, %79, %cst_50 {dimension_numbers = #tpu.dot_dimension_numbers<[1], [0], [0], [1], [0, 0, 1, 1], [], []>} : vector<144x4xbf16>, vector<4x32xbf16>, vector<144x32xf32> -> vector<144x32xf32>
    %81 = arith.addf %71, %80 : vector<144x32xf32>
    %c36_i32_51 = arith.constant 36 : i32
    %82 = arith.addi %0, %c36_i32_51 : i32
    %c2_i32_52 = arith.constant 2 : i32
    %83 = arith.addi %82, %c2_i32_52 : i32
    %c0_53 = arith.constant 0 : index
    %84 = arith.index_cast %83 : i32 to index
    %c0_54 = arith.constant 0 : index
    %85 = vector.load %arg2[%c0_53, %84, %c0_54] : memref<1x328x4xf32, #tpu.memory_space<vmem>>, vector<1x144x4xf32>
    %86 = vector.shape_cast %85 : vector<1x144x4xf32> to vector<144x4xf32>
    %87 = arith.truncf %86 : vector<144x4xf32> to vector<144x4xbf16>
    %c8 = arith.constant 8 : index
    %c0_55 = arith.constant 0 : index
    %c0_56 = arith.constant 0 : index
    %88 = vector.load %arg3[%c8, %c0_55, %c0_56] : memref<9x4x32xbf16, #tpu.memory_space<vmem>>, vector<1x4x32xbf16>
    %89 = vector.shape_cast %88 : vector<1x4x32xbf16> to vector<4x32xbf16>
    %cst_57 = arith.constant dense<0.000000e+00> : vector<144x32xf32>
    %90 = tpu.matmul %87, %89, %cst_57 {dimension_numbers = #tpu.dot_dimension_numbers<[1], [0], [0], [1], [0, 0, 1, 1], [], []>} : vector<144x4xbf16>, vector<4x32xbf16>, vector<144x32xf32> -> vector<144x32xf32>
    %91 = arith.addf %81, %90 : vector<144x32xf32>
    %c0_58 = arith.constant 0 : index
    %c0_59 = arith.constant 0 : index
    %92 = vector.load %arg4[%c0_58, %c0_59] : memref<1x32xf32, #tpu.memory_space<vmem>>, vector<1x32xf32>
    %93 = vector.broadcast %92 : vector<1x32xf32> to vector<144x32xf32>
    %94 = arith.addf %91, %93 : vector<144x32xf32>
    %cst_60 = arith.constant 0.000000e+00 : f32
    %95 = vector.broadcast %cst_60 : f32 to vector<144x32xf32>
    %96 = arith.maximumf %94, %95 : vector<144x32xf32>
    %97 = arith.truncf %96 : vector<144x32xf32> to vector<144x32xbf16>
    %c0_61 = arith.constant 0 : index
    %c0_62 = arith.constant 0 : index
    %98 = vector.load %arg5[%c0_61, %c0_62] : memref<32x16xbf16, #tpu.memory_space<vmem>>, vector<32x16xbf16>
    %cst_63 = arith.constant dense<0.000000e+00> : vector<144x16xf32>
    %99 = tpu.matmul %97, %98, %cst_63 {dimension_numbers = #tpu.dot_dimension_numbers<[1], [0], [0], [1], [0, 0, 1, 1], [], []>} : vector<144x32xbf16>, vector<32x16xbf16>, vector<144x16xf32> -> vector<144x16xf32>
    %c0_64 = arith.constant 0 : index
    %c0_65 = arith.constant 0 : index
    %100 = vector.load %arg6[%c0_64, %c0_65] : memref<1x16xf32, #tpu.memory_space<vmem>>, vector<1x16xf32>
    %101 = vector.broadcast %100 : vector<1x16xf32> to vector<144x16xf32>
    %102 = arith.addf %99, %101 : vector<144x16xf32>
    %103 = vector.extract_strided_slice %102 {offsets = [0, 0], sizes = [144, 8], strides = [1, 1]} : vector<144x16xf32> to vector<144x8xf32>
    %104 = vector.extract_strided_slice %102 {offsets = [0, 8], sizes = [144, 8], strides = [1, 1]} : vector<144x16xf32> to vector<144x8xf32>
    %105 = math.exp %104 : vector<144x8xf32>
    %c0_66 = arith.constant 0 : index
    %c0_67 = arith.constant 0 : index
    %c0_68 = arith.constant 0 : index
    %106 = vector.load %arg7[%c0_66, %c0_67, %c0_68] : memref<1x144x8xbf16, #tpu.memory_space<vmem>>, vector<1x144x8xbf16>
    %107 = vector.shape_cast %106 : vector<1x144x8xbf16> to vector<144x8xbf16>
    %108 = arith.extf %107 : vector<144x8xbf16> to vector<144x8xf32>
    %109 = arith.mulf %108, %105 : vector<144x8xf32>
    %110 = arith.addf %103, %109 : vector<144x8xf32>
    %c0_69 = arith.constant 0 : index
    %c0_70 = arith.constant 0 : index
    %c0_71 = arith.constant 0 : index
    %111 = vector.load %arg8[%c0_69, %c0_70, %c0_71] : memref<1x144x8xf32, #tpu.memory_space<vmem>>, vector<1x144x8xf32>
    %112 = vector.shape_cast %111 : vector<1x144x8xf32> to vector<144x8xf32>
    %113 = vector.shape_cast %110 : vector<144x8xf32> to vector<1x144x8xf32>
    tpu.vector_store %arg8[%c0_69, %c0_70, %c0_71], %113 {strides = array<i32>} : memref<1x144x8xf32, #tpu.memory_space<vmem>>, vector<1x144x8xf32>,
    return
  }
  func.func @transform_0(%arg0: i32, %arg1: i32) -> (i32, i32, i32) {
    %c0_i32 = arith.constant 0 : i32
    %c0_i32_0 = arith.constant 0 : i32
    %c0_i32_1 = arith.constant 0 : i32
    return %arg0, %c0_i32, %c0_i32_0 : i32, i32, i32
  }
  func.func @transform_1(%arg0: i32, %arg1: i32) -> (i32, i32, i32) {
    %c0_i32 = arith.constant 0 : i32
    %c0_i32_0 = arith.constant 0 : i32
    %c0_i32_1 = arith.constant 0 : i32
    %c0_i32_2 = arith.constant 0 : i32
    return %c0_i32, %c0_i32_0, %c0_i32_1 : i32, i32, i32
  }
  func.func @transform_2(%arg0: i32, %arg1: i32) -> (i32, i32) {
    %c0_i32 = arith.constant 0 : i32
    %c0_i32_0 = arith.constant 0 : i32
    %c0_i32_1 = arith.constant 0 : i32
    return %c0_i32, %c0_i32_0 : i32, i32
  }
  func.func @transform_3(%arg0: i32, %arg1: i32) -> (i32, i32) {
    %c0_i32 = arith.constant 0 : i32
    %c0_i32_0 = arith.constant 0 : i32
    %c0_i32_1 = arith.constant 0 : i32
    return %c0_i32, %c0_i32_0 : i32, i32
  }
  func.func @transform_4(%arg0: i32, %arg1: i32) -> (i32, i32) {
    %c0_i32 = arith.constant 0 : i32
    %c0_i32_0 = arith.constant 0 : i32
    %c0_i32_1 = arith.constant 0 : i32
    return %c0_i32, %c0_i32_0 : i32, i32
  }
  func.func @transform_5(%arg0: i32, %arg1: i32) -> (i32, i32, i32) {
    %c0_i32 = arith.constant 0 : i32
    %c0_i32_0 = arith.constant 0 : i32
    return %arg0, %arg1, %c0_i32 : i32, i32, i32
  }
  func.func @transform_6(%arg0: i32, %arg1: i32) -> (i32, i32, i32) {
    %c0_i32 = arith.constant 0 : i32
    %c0_i32_0 = arith.constant 0 : i32
    return %arg0, %arg1, %c0_i32 : i32, i32, i32
  }
}

</mosaic_0001>

<bundles_post_ra>
// kernel: stage1_wrapper_forward.1
= control target key start
LH: loop header
LB: loop body
LE: loop exit
PB: predicated region body
PF: predicated region fallthrough
CT: control target
= control target key end

     0   :  { %s2417_s21 = smov 0   ;;  %s2419_s22 = smov 0   ;;  %s3074_s0 = inlined_call_operand.vmem [shape: f32[2,328,4], index: 0, kind: input, shape index: {}]   ;;  %s3075_s1 = inlined_call_operand.vmem [shape: bf16[9,4,32], index: 1, kind: input, shape index: {}]   ;;  %s3076_s2 = inlined_call_operand.vmem [shape: f32[1,32], index: 2, kind: input, shape index: {}]   ;;  %s3077_s3 = inlined_call_operand.vmem [shape: bf16[32,16], index: 3, kind: input, shape index: {}]   ;;  %s3078_s4 = inlined_call_operand.vmem [shape: f32[1,16], index: 4, kind: input, shape index: {}]   ;;  %s3079_s5 = inlined_call_operand.vmem [shape: bf16[2,288,8], index: 5, kind: input, shape index: {}]   ;;  %s3080_s6 = inlined_call_operand.vmem [shape: f32[2,288,8], index: 6, kind: output, shape index: {}]  }
   0x1   :  { %s2421_s23 = smov 0   ;;  %s2423_s24 = smov 0  }
   0x2   :  { %s2425_s25 = smov 0  }
   0x3 LB: > { %s25_s26 = sadd.s32 1, %s2371_s23  ;;  %s28_s27 = sadd.s32 1, %s2375_s24  ;;  %s2379_s25 = sphi %s2425_s25, %s16_s25   ;;  %s2375_s24 = sphi %s2423_s24, %s3084_s24   ;;  %s2371_s23 = sphi %s2421_s23, %s3083_s23   ;;  %s2367_s22 = sphi %s2419_s22, %s3082_s22   ;;  %s2363_s21 = sphi %s2417_s21, %s3081_s21  }
   0x4   : > { %p26_p0 = scmp.ge.s32.totalorder %s25_s26, 2  ;;  %p1956_p1 = scmp.ge.s32.totalorder %s2379_s25, 1 }
   0x5   : > { %p243_p2 = scmp.lt.s32.totalorder %s2379_s25, 5 }
   0x6   : > { %s3086_s26 = smov (%p26_p0, %s25_s26), 0  ;;  %s3088_s27 = smov (!%p26_p0, %s28_s27), %s2375_s24 }
   0x7   : > { %p244_p3 = pnand %p1956_p1, %p243_p2  ;;  %p30_p4 = scmp.ge.s32.totalorder %s3088_s27, 2 }
   0x8   : > { %p286_p5 = scmp.lt.s32.totalorder (!%p244_p3), %s2367_s22, 1  ;;  %s312_s8 = smul.u32 (!%p244_p3), 144, %s2363_s21 }
   0x9   : > { %s3090_s27 = smov (%p30_p4, %s3088_s27), 0  ;;  %247 = sbr.rel (%p244_p3) target bundleno = 774 (0x306), region = 44 }
   0xa   : > { %s291_s20 = smul.u32 (!%p244_p3), 18, %s2363_s21 }
   0xc   : > { %p294_p6 = scmp.lt.s32.totalorder (!%p244_p3), %s291_s20, 35 }
   0xe   : > { %v1978_v0 = vld [vmem:[%s3075_s1 + $0x2] sm:$0x3]  ;;  %vm401_vm0 = vcmask 1041408   ;;  %v341_v1 = vld [vmem:[%s3075_s1] sm:$0x3]  ;;  %s3092_s22 = smov (!%p286_p5, %s2367_s22), 1 }
   0xf   : > { %v403_v2 = vsel %vm401_vm0, %v1978_v0, 0  ;;  %v487_v3 = vsel %vm401_vm0, %v341_v1, 0  ;;  %v2071_v4 = vld [vmem:[%s3075_s1 + $0x8] sm:$0x3]  ;;  %v2015_v6 = vld [vmem:[%s3075_s1 + $0x4] sm:$0x3] }
  0x10   : > { %412 = vmatpush.bf16.msra.mxu0 %v403_v2  ;;  %2258 = vmatpush.bf16.msra.mxu2 %v403_v2  ;;  %v868_v5 = vsel %vm401_vm0, %v2071_v4, 0  ;;  %v2043_v7 = vld [vmem:[%s3075_s1 + $0x6] sm:$0x3]  ;;  %v602_v8 = vsel %vm401_vm0, %v2015_v6, 0  ;;  %s2260_s15 = smul.u32 328, %s3092_s22  ;;  %vm373_vm1 = vcmask 31744  }
  0x11   : > { %496 = vmatpush.bf16.msra.mxu1 %v487_v3  ;;  %2259 = vmatpush.bf16.msra.mxu3 %v487_v3  ;;  %v735_v9 = vsel %vm401_vm0, %v2043_v7, 0  ;;  %v2127_v46 = vld [vmem:[%s3075_s1 + $0xc] sm:$0x3]  ;;  %v2155_v47 = vld [vmem:[%s3075_s1 + $0xe] sm:$0x3]  ;;  %vm1543_vm2 = vcmask 261120  }
  0x12   : > { %s290_s18 = scalar_lea.vmem %s3074_s0, %s2260_s15  ;;  %v2099_v48 = vld [vmem:[%s3075_s1 + $0xa] sm:$0x3]  ;;  %v1134_v49 = vsel %vm401_vm0, %v2127_v46, 0  ;;  %v1267_v50 = vsel %vm401_vm0, %v2155_v47, 0  ;;  %v2183_v0 = vld [vmem:[%s3075_s1 + $0x10] sm:$0x3] }
  0x13   : > { %s2476_s19 = scalar_lea.vmem %s290_s18, %s312_s8  ;;  %v1001_v51 = vsel %vm401_vm0, %v2099_v48, 0  ;;  %v1400_v1 = vsel %vm401_vm0, %v2183_v0, 0  ;;  %s3094_s20 = smov (!%p294_p6, %s291_s20), 35  ;;  %vm1805_vm3 = vcmask 64512  }
  0x14   : > { %877 = vmatpush.bf16.msrb.mxu0 %v868_v5  ;;  %611 = vmatpush.bf16.msrb.mxu2 %v602_v8  ;;  %v1960_v10 = vld [vmem:[%s2476_s19 + $0x1] sm:$0xff]  ;;  %v1961_v11 = vld [vmem:[%s2476_s19 + $0x9] sm:$0xff]  ;;  %v1970_v12 = vld [vmem:[%s2476_s19 + $0x51] sm:$0xff]  ;;  %s2261_s28 = smul.u32 36, %s3092_s22 }
  0x15   : > { %744 = vmatpush.bf16.msrb.mxu3 %v735_v9  ;;  %v362_v13 = vpack.c.bf16 %v1961_v11, %v1960_v10  ;;  %v1971_v14 = vld [vmem:[%s2476_s19 + $0x59] sm:$0xff]  ;;  %v315_v16 = vld [vmem:[%s2476_s19 + $0x8] sm:$0xff]  ;;  %v324_v19 = vld [vmem:[%s2476_s19 + $0x50] sm:$0xff]  ;;  %1010 = vmatpush.bf16.msrb.mxu1 %v1001_v51 }
  0x16   : > { %v314_v15 = vld [vmem:[%s2476_s19] sm:$0xff]  ;;  %v367_v17 = vpack.c.bf16 %v1971_v14, %v1970_v12  ;;  %v325_v20 = vld [vmem:[%s2476_s19 + $0x58] sm:$0xff]  ;;  %v1973_v25 = vld [vmem:[%s2476_s19 + $0x69] sm:$0xff]  ;;  %s297_s21 = sadd.s32 %s2261_s28, %s3094_s20 }
  0x17   : > { %v332_v18 = vpack.c.bf16 %v315_v16, %v314_v15  ;;  %1979 = vmatmul.msk.bf16.vlgmr.msra.gmra.mxu0 %vm373_vm1, %v362_v13  ;;  %v337_v21 = vpack.c.bf16 %v325_v20, %v324_v19  ;;  %v1962_v22 = vld [vmem:[%s2476_s19 + $0x11] sm:$0xff]  ;;  %v1963_v23 = vld [vmem:[%s2476_s19 + $0x19] sm:$0xff]  ;;  %v1972_v24 = vld [vmem:[%s2476_s19 + $0x61] sm:$0xff]  ;;  %s1958_s29 = sshll.u32 %s297_s21, 2  ;;  %s1959_s22 = sshll.u32 %s297_s21, 3 }
  0x18   : > { %1984 = vmatmul.msk.bf16.vlgmr.msra.gmra.mxu2 %vm373_vm1, %v367_v17  ;;  %v316_v26 = vld [vmem:[%s2476_s19 + $0x10] sm:$0xff]  ;;  %v317_v27 = vld [vmem:[%s2476_s19 + $0x18] sm:$0xff]  ;;  %v326_v28 = vld [vmem:[%s2476_s19 + $0x60] sm:$0xff]  ;;  %v363_v30 = vpack.c.bf16 %v1963_v23, %v1962_v22  ;;  %v368_v31 = vpack.c.bf16 %v1973_v25, %v1972_v24  ;;  %1409 = vmatpush.bf16.msra.mxu0 %v1400_v1  ;;  %s2973_s8 = scalar_lea.vmem %s3079_s5, %s1958_s29  ;;  %s2984_s11 = scalar_lea.vmem %s3080_s6, %s1959_s22 }
  0x19   : > { %1988 = vmatmul.msk.bf16.vlgmr.msra.gmra.mxu1 %vm373_vm1, %v332_v18  ;;  %1993 = vmatmul.msk.bf16.vlgmr.msra.gmra.mxu3 %vm373_vm1, %v337_v21  ;;  %v327_v29 = vld [vmem:[%s2476_s19 + $0x68] sm:$0xff]  ;;  %v333_v32 = vpack.c.bf16 %v317_v27, %v316_v26  ;;  %v1974_v36 = vld [vmem:[%s2476_s19 + $0x71] sm:$0xff]  ;;  %v1975_v37 = vld [vmem:[%s2476_s19 + $0x79] sm:$0xff] }
  0x1a   : > { %v338_v33 = vpack.c.bf16 %v327_v29, %v326_v28  ;;  %v1964_v34 = vld [vmem:[%s2476_s19 + $0x21] sm:$0xff]  ;;  %v1965_v35 = vld [vmem:[%s2476_s19 + $0x29] sm:$0xff]  ;;  %v329_v41 = vld [vmem:[%s2476_s19 + $0x78] sm:$0xff]  ;;  %v369_v43 = vpack.c.bf16 %v1975_v37, %v1974_v36  ;;  %1143 = vmatpush.bf16.msra.mxu2 %v1134_v49  ;;  %1276 = vmatpush.bf16.msra.mxu3 %v1267_v50 }
  0x1b   : > { %v318_v38 = vld [vmem:[%s2476_s19 + $0x20] sm:$0xff]  ;;  %v319_v39 = vld [vmem:[%s2476_s19 + $0x28] sm:$0xff]  ;;  %v328_v40 = vld [vmem:[%s2476_s19 + $0x70] sm:$0xff]  ;;  %v364_v42 = vpack.c.bf16 %v1965_v35, %v1964_v34 }
  0x1c   : > { %v334_v44 = vpack.c.bf16 %v319_v39, %v318_v38  ;;  %v339_v45 = vpack.c.bf16 %v329_v41, %v328_v40  ;;  %v1966_v52 = vld [vmem:[%s2476_s19 + $0x31] sm:$0xff]  ;;  %v1967_v53 = vld [vmem:[%s2476_s19 + $0x39] sm:$0xff]  ;;  %v1976_v54 = vld [vmem:[%s2476_s19 + $0x81] sm:$0xff] }
  0x1d   : > { %v1977_v55 = vld [vmem:[%s2476_s19 + $0x89] sm:$0xff]  ;;  %v321_v57 = vld [vmem:[%s2476_s19 + $0x38] sm:$0xff]  ;;  %v330_v58 = vld [vmem:[%s2476_s19 + $0x80] sm:$0xff]  ;;  %v365_v60 = vpack.c.bf16 %v1967_v53, %v1966_v52 }
  0x1e   : > { %v320_v56 = vld [vmem:[%s2476_s19 + $0x30] sm:$0xff]  ;;  %v331_v59 = vld [vmem:[%s2476_s19 + $0x88] sm:$0xff]  ;;  %v370_v61 = vpack.c.bf16 %v1977_v55, %v1976_v54  ;;  %v322_v4 = vld [vmem:[%s2476_s19 + $0x40] sm:$0xff] }
  0x1f   : > { %v335_v62 = vpack.c.bf16 %v321_v57, %v320_v56  ;;  %v340_v63 = vpack.c.bf16 %v331_v59, %v330_v58  ;;  %v1968_v2 = vld [vmem:[%s2476_s19 + $0x41] sm:$0xff]  ;;  %v1969_v3 = vld [vmem:[%s2476_s19 + $0x49] sm:$0xff]  ;;  %v2025_v8 = vld [vmem:[%s2476_s19 + $0x12] sm:$0xff] }
  0x20   : > { %v323_v5 = vld [vmem:[%s2476_s19 + $0x48] sm:$0xff]  ;;  %v2026_v9 = vld [vmem:[%s2476_s19 + $0x1a] sm:$0xff]  ;;  %v366_v10 = vpack.c.bf16 %v1969_v3, %v1968_v2  ;;  %v2029_v27 = vld [vmem:[%s2476_s19 + $0x32] sm:$0xff] }
  0x21   : > { %v1997_v6 = vld [vmem:[%s2476_s19 + $0x2] sm:$0xff]  ;;  %v1998_v7 = vld [vmem:[%s2476_s19 + $0xa] sm:$0xff]  ;;  %v336_v11 = vpack.c.bf16 %v323_v5, %v322_v4  ;;  %v696_v13 = vpack.c.bf16 %v2026_v9, %v2025_v8  ;;  %v2053_v14 = vld [vmem:[%s2476_s19 + $0x13] sm:$0xff] }
  0x22   : > { %v563_v12 = vpack.c.bf16 %v1998_v7, %v1997_v6  ;;  %v2054_v15 = vld [vmem:[%s2476_s19 + $0x1b] sm:$0xff]  ;;  %v2028_v19 = vld [vmem:[%s2476_s19 + $0x2a] sm:$0xff]  ;;  %v2061_v59 = vld [vmem:[%s2476_s19 + $0x53] sm:$0xff] }
  0x23   : > { %v2081_v16 = vld [vmem:[%s2476_s19 + $0x14] sm:$0xff]  ;;  %v2082_v17 = vld [vmem:[%s2476_s19 + $0x1c] sm:$0xff]  ;;  %v829_v20 = vpack.c.bf16 %v2054_v15, %v2053_v14  ;;  %v2056_v24 = vld [vmem:[%s2476_s19 + $0x2b] sm:$0xff] }
  0x24   : > { %v2027_v18 = vld [vmem:[%s2476_s19 + $0x22] sm:$0xff]  ;;  %v962_v21 = vpack.c.bf16 %v2082_v17, %v2081_v16  ;;  %v2084_v26 = vld [vmem:[%s2476_s19 + $0x2c] sm:$0xff]  ;;  %v2030_v28 = vld [vmem:[%s2476_s19 + $0x3a] sm:$0xff] }
  0x25   : > { %v697_v22 = vpack.c.bf16 %v2028_v19, %v2027_v18  ;;  %v2055_v23 = vld [vmem:[%s2476_s19 + $0x23] sm:$0xff]  ;;  %v2085_v34 = vld [vmem:[%s2476_s19 + $0x34] sm:$0xff]  ;;  %v2064_v17 = vld [vmem:[%s2476_s19 + $0x6b] sm:$0xff] }
  0x26   : > { %v2083_v25 = vld [vmem:[%s2476_s19 + $0x24] sm:$0xff]  ;;  %v830_v29 = vpack.c.bf16 %v2056_v24, %v2055_v23  ;;  %v2086_v35 = vld [vmem:[%s2476_s19 + $0x3c] sm:$0xff]  ;;  %v2092_v19 = vld [vmem:[%s2476_s19 + $0x6c] sm:$0xff] }
  0x27   : > { %1980 = vmatmul.msk.bf16.gmra.mxu0 %vm373_vm1, %v363_v30  ;;  %v2570_v30 = vpack.c.bf16 %v2084_v26, %v2083_v25  ;;  %v2031_v36 = vld [vmem:[%s2476_s19 + $0x42] sm:$0xff]  ;;  %v2032_v37 = vld [vmem:[%s2476_s19 + $0x4a] sm:$0xff]  ;;  %v2583_v39 = vpack.c.bf16 %v2086_v35, %v2085_v34  ;;  %v2034_v46 = vld [vmem:[%s2476_s19 + $0x5a] sm:$0xff] }
  0x28   : > { %1985 = vmatmul.msk.bf16.gmra.mxu2 %vm373_vm1, %v368_v31  ;;  %v698_v31 = vpack.c.bf16 %v2030_v28, %v2029_v27  ;;  %v699_v40 = vpack.c.bf16 %v2032_v37, %v2031_v36  ;;  %v2059_v41 = vld [vmem:[%s2476_s19 + $0x43] sm:$0xff]  ;;  %v2065_v37 = vld [vmem:[%s2476_s19 + $0x73] sm:$0xff] }
  0x29   : > { %1989 = vmatmul.msk.bf16.gmra.mxu1 %vm373_vm1, %v333_v32  ;;  %1994 = vmatmul.msk.bf16.gmra.mxu3 %vm373_vm1, %v338_v33  ;;  %v2057_v32 = vld [vmem:[%s2476_s19 + $0x33] sm:$0xff]  ;;  %v2058_v33 = vld [vmem:[%s2476_s19 + $0x3b] sm:$0xff]  ;;  %v2036_v0 = vld [vmem:[%s2476_s19 + $0x6a] sm:$0xff] }
  0x2a   : > { %v831_v38 = vpack.c.bf16 %v2058_v33, %v2057_v32  ;;  %v2063_v16 = vld [vmem:[%s2476_s19 + $0x63] sm:$0xff] }
  0x2b   : > { %v2091_v18 = vld [vmem:[%s2476_s19 + $0x64] sm:$0xff]  ;;  %v834_v23 = vpack.c.bf16 %v2064_v17, %v2063_v16 }
  0x2c   : > { %v2636_v26 = vpack.c.bf16 %v2092_v19, %v2091_v18  ;;  %v2213_v18 = vld [vmem:[%s3077_s3 + $0x8] sm:$0xff] }
  0x2d   : > { %1577 = vmatpush.bf16.msra.mxu1 %v2213_v18 }
  0x37   : > { %1981 = vmatmul.msk.bf16.gmra.mxu0 %vm373_vm1, %v364_v42  ;;  %v2060_v42 = vld [vmem:[%s2476_s19 + $0x4b] sm:$0xff] }
  0x38   : > { %1986 = vmatmul.msk.bf16.gmra.mxu2 %vm373_vm1, %v369_v43  ;;  %v2087_v43 = vld [vmem:[%s2476_s19 + $0x44] sm:$0xff]  ;;  %v832_v47 = vpack.c.bf16 %v2060_v42, %v2059_v41  ;;  %v2094_v41 = vld [vmem:[%s2476_s19 + $0x7c] sm:$0xff] }
  0x39   : > { %1990 = vmatmul.msk.bf16.gmra.mxu1 %vm373_vm1, %v334_v44  ;;  %1995 = vmatmul.msk.bf16.gmra.mxu3 %vm373_vm1, %v339_v45  ;;  %v2088_v44 = vld [vmem:[%s2476_s19 + $0x4c] sm:$0xff]  ;;  %v2039_v42 = vld [vmem:[%s2476_s19 + $0x82] sm:$0xff] }
  0x3a   : > { %v2033_v45 = vld [vmem:[%s2476_s19 + $0x52] sm:$0xff]  ;;  %v2596_v49 = vpack.c.bf16 %v2088_v44, %v2087_v43  ;;  %v2040_v43 = vld [vmem:[%s2476_s19 + $0x8a] sm:$0xff] }
  0x3b   : > { %v700_v51 = vpack.c.bf16 %v2034_v46, %v2033_v45 }
  0x47   : > { %1982 = vmatmul.msk.bf16.gmra.mxu0 %vm373_vm1, %v365_v60  ;;  %v2062_v60 = vld [vmem:[%s2476_s19 + $0x5b] sm:$0xff] }
  0x48   : > { %1987 = vmatmul.msk.bf16.gmra.mxu2 %vm373_vm1, %v370_v61  ;;  %v2089_v61 = vld [vmem:[%s2476_s19 + $0x54] sm:$0xff]  ;;  %v833_v2 = vpack.c.bf16 %v2062_v60, %v2061_v59 }
  0x49   : > { %1991 = vmatmul.msk.bf16.gmra.mxu1 %vm373_vm1, %v335_v62  ;;  %1996 = vmatmul.msk.bf16.gmra.mxu3 %vm373_vm1, %v340_v63  ;;  %v2090_v62 = vld [vmem:[%s2476_s19 + $0x5c] sm:$0xff] }
  0x4a   : > { %v2035_v63 = vld [vmem:[%s2476_s19 + $0x62] sm:$0xff]  ;;  %v2615_v5 = vpack.c.bf16 %v2090_v62, %v2089_v61 }
  0x4b   : > { %v701_v8 = vpack.c.bf16 %v2036_v0, %v2035_v63  ;;  %v2067_v62 = vld [vmem:[%s2476_s19 + $0x83] sm:$0xff]  ;;  %v2068_v63 = vld [vmem:[%s2476_s19 + $0x8b] sm:$0xff] }
  0x4c   : > { %v2095_v0 = vld [vmem:[%s2476_s19 + $0x84] sm:$0xff] }
  0x57   : > { %1983 = vmatmul.msk.bf16.gmra.mxu0 %vm373_vm1, %v366_v10 }
  0x58   : > { %2016 = vmatmul.msk.bf16.vlgmr.msrb.gmra.mxu2 %vm373_vm1, %v563_v12 }
  0x59   : > { %1992 = vmatmul.msk.bf16.gmra.mxu1 %vm373_vm1, %v336_v11  ;;  %2044 = vmatmul.msk.bf16.vlgmr.msrb.gmra.mxu3 %vm373_vm1, %v696_v13 }
  0x67   : > { %2072 = vmatmul.msk.bf16.vlgmr.msrb.gmra.mxu0 %vm373_vm1, %v829_v20  ;;  %v2037_v20 = vld [vmem:[%s2476_s19 + $0x72] sm:$0xff] }
  0x68   : > { %2017 = vmatmul.msk.bf16.gmra.mxu2 %vm373_vm1, %v696_v13 }
  0x69   : > { %2100 = vmatmul.msk.bf16.vlgmr.msrb.gmra.mxu1 %vm373_vm1, %v962_v21  ;;  %2045 = vmatmul.msk.bf16.gmra.mxu3 %vm373_vm1, %v697_v22  ;;  %v2038_v21 = vld [vmem:[%s2476_s19 + $0x7a] sm:$0xff] }
  0x77   : > { %2073 = vmatmul.msk.bf16.gmra.mxu0 %vm373_vm1, %v830_v29  ;;  %v702_v29 = vpack.c.bf16 %v2038_v21, %v2037_v20 }
  0x78   : > { %2018 = vmatmul.msk.bf16.gmra.mxu2 %vm373_vm1, %v697_v22 }
  0x79   : > { %2101 = vmatmul.msk.bf16.gmra.mxu1 %vm373_vm1, %v2570_v30  ;;  %2046 = vmatmul.msk.bf16.gmra.mxu3 %vm373_vm1, %v698_v31 }
  0x87   : > { %2074 = vmatmul.msk.bf16.gmra.mxu0 %vm373_vm1, %v831_v38  ;;  %v2066_v38 = vld [vmem:[%s2476_s19 + $0x7b] sm:$0xff] }
  0x88   : > { %2019 = vmatmul.msk.bf16.gmra.mxu2 %vm373_vm1, %v698_v31  ;;  %v835_v45 = vpack.c.bf16 %v2066_v38, %v2065_v37 }
  0x89   : > { %2102 = vmatmul.msk.bf16.gmra.mxu1 %vm373_vm1, %v2583_v39  ;;  %2047 = vmatmul.msk.bf16.gmra.mxu3 %vm373_vm1, %v699_v40 }
  0x94   : > { %v414_v48 = vpop.f32.mrf.mxu0 }
  0x96   : > { %v498_v50 = vpop.f32.mrf.mxu1 }
  0x97   : > { %v2598_v52 = vadd.f32 %v498_v50, %v414_v48  ;;  %2075 = vmatmul.msk.bf16.gmra.mxu0 %vm373_vm1, %v832_v47 }
  0x98   : > { %2020 = vmatmul.msk.bf16.gmra.mxu2 %vm373_vm1, %v699_v40  ;;  %v2093_v40 = vld [vmem:[%s2476_s19 + $0x74] sm:$0xff] }
  0x99   : > { %2103 = vmatmul.msk.bf16.gmra.mxu1 %vm373_vm1, %v2596_v49  ;;  %2048 = vmatmul.msk.bf16.gmra.mxu3 %vm373_vm1, %v700_v51  ;;  %v2659_v48 = vpack.c.bf16 %v2094_v41, %v2093_v40 }
  0x9b   : > { %v439_v53 = vpop.f32.mrf.mxu2 }
  0x9c   : > { %v523_v54 = vpop.f32.mrf.mxu3  ;;  %v416_v55 = vpop.f32.mrf.mxu0 }
  0x9d   : > { %v2605_v56 = vadd.f32 %v523_v54, %v439_v53  ;;  %v703_v53 = vpack.c.bf16 %v2040_v43, %v2039_v42 }
  0x9e   : > { %v500_v57 = vpop.f32.mrf.mxu1 }
  0x9f   : > { %v2607_v58 = vadd.f32 %v500_v57, %v416_v55 }
  0xa3   : > { %v441_v1 = vpop.f32.mrf.mxu2 }
  0xa4   : > { %v525_v3 = vpop.f32.mrf.mxu3  ;;  %v419_v4 = vpop.f32.mrf.mxu0 }
  0xa5   : > { %v2617_v6 = vadd.f32 %v525_v3, %v441_v1  ;;  %v2096_v1 = vld [vmem:[%s2476_s19 + $0x8c] sm:$0xff]  ;;  %v2042_v3 = vld [vmem:[%s2476_s19 + $0x9a] sm:$0xff] }
  0xa6   : > { %v503_v7 = vpop.f32.mrf.mxu1 }
  0xa7   : > { %v2619_v9 = vadd.f32 %v503_v7, %v419_v4  ;;  %2076 = vmatmul.msk.bf16.gmra.mxu0 %vm373_vm1, %v833_v2  ;;  %v2041_v2 = vld [vmem:[%s2476_s19 + $0x92] sm:$0xff]  ;;  %v836_v7 = vpack.c.bf16 %v2068_v63, %v2067_v62 }
  0xa8   : > { %2021 = vmatmul.msk.bf16.gmra.mxu2 %vm373_vm1, %v700_v51  ;;  %v704_v16 = vpack.c.bf16 %v2042_v3, %v2041_v2  ;;  %v2166_v62 = vld [vmem:[%s2476_s19 + $0x2e] sm:$0xff] }
  0xa9   : > { %2104 = vmatmul.msk.bf16.gmra.mxu1 %vm373_vm1, %v2615_v5  ;;  %2049 = vmatmul.msk.bf16.gmra.mxu3 %vm373_vm1, %v701_v8  ;;  %v2139_v63 = vld [vmem:[%s2476_s19 + $0x35] sm:$0xff] }
  0xab   : > { %v444_v10 = vpop.f32.mrf.mxu2 }
  0xac   : > { %v528_v11 = vpop.f32.mrf.mxu3  ;;  %v421_v12 = vpop.f32.mrf.mxu0 }
  0xad   : > { %v2626_v13 = vadd.f32 %v528_v11, %v444_v10  ;;  %v2682_v11 = vpack.c.bf16 %v2096_v1, %v2095_v0  ;;  %v2140_v0 = vld [vmem:[%s2476_s19 + $0x3d] sm:$0xff] }
  0xae   : > { %v505_v14 = vpop.f32.mrf.mxu1 }
  0xaf   : > { %v2628_v15 = vadd.f32 %v505_v14, %v421_v12 }
  0xb3   : > { %v446_v22 = vpop.f32.mrf.mxu2 }
  0xb4   : > { %v530_v24 = vpop.f32.mrf.mxu3  ;;  %v424_v25 = vpop.f32.mrf.mxu0 }
  0xb5   : > { %v2638_v27 = vadd.f32 %v530_v24, %v446_v22  ;;  %v2069_v24 = vld [vmem:[%s2476_s19 + $0x93] sm:$0xff] }
  0xb6   : > { %v508_v28 = vpop.f32.mrf.mxu1 }
  0xb7   : > { %v2640_v31 = vadd.f32 %v508_v28, %v424_v25  ;;  %2077 = vmatmul.msk.bf16.gmra.mxu0 %vm373_vm1, %v834_v23  ;;  %v2070_v25 = vld [vmem:[%s2476_s19 + $0x9b] sm:$0xff] }
  0xb8   : > { %2022 = vmatmul.msk.bf16.gmra.mxu2 %vm373_vm1, %v701_v8  ;;  %v2097_v28 = vld [vmem:[%s2476_s19 + $0x94] sm:$0xff]  ;;  %v837_v38 = vpack.c.bf16 %v2070_v25, %v2069_v24  ;;  %v2141_v24 = vld [vmem:[%s2476_s19 + $0x45] sm:$0xff] }
  0xb9   : > { %2105 = vmatmul.msk.bf16.gmra.mxu1 %vm373_vm1, %v2636_v26  ;;  %2050 = vmatmul.msk.bf16.gmra.mxu3 %vm373_vm1, %v702_v29  ;;  %v2142_v25 = vld [vmem:[%s2476_s19 + $0x4d] sm:$0xff] }
  0xbb   : > { %v449_v32 = vpop.f32.mrf.mxu2 }
  0xbc   : > { %v533_v33 = vpop.f32.mrf.mxu3  ;;  %v2647_v34 = vpop.f32.mrf.mxu0 }
  0xbd   : > { %v2649_v35 = vadd.f32 %v533_v33, %v449_v32  ;;  %v2137_v32 = vld [vmem:[%s2476_s19 + $0x25] sm:$0xff]  ;;  %v2138_v33 = vld [vmem:[%s2476_s19 + $0x2d] sm:$0xff] }
  0xbe   : > { %v2651_v36 = vpop.f32.mrf.mxu1 }
  0xc3   : > { %v451_v44 = vpop.f32.mrf.mxu2 }
  0xc4   : > { %v535_v46 = vpop.f32.mrf.mxu3  ;;  %v429_v47 = vpop.f32.mrf.mxu0 }
  0xc5   : > { %v2661_v50 = vadd.f32 %v535_v46, %v451_v44  ;;  %v1228_v44 = vpack.c.bf16 %v2138_v33, %v2137_v32 }
  0xc6   : > { %v513_v51 = vpop.f32.mrf.mxu1 }
  0xc7   : > { %v2663_v54 = vadd.f32 %v513_v51, %v429_v47  ;;  %2078 = vmatmul.msk.bf16.gmra.mxu0 %vm373_vm1, %v835_v45 }
  0xc8   : > { %2023 = vmatmul.msk.bf16.gmra.mxu2 %vm373_vm1, %v702_v29  ;;  %v2098_v29 = vld [vmem:[%s2476_s19 + $0x9c] sm:$0xff] }
  0xc9   : > { %2106 = vmatmul.msk.bf16.gmra.mxu1 %vm373_vm1, %v2659_v48  ;;  %2051 = vmatmul.msk.bf16.gmra.mxu3 %vm373_vm1, %v703_v53  ;;  %v2706_v43 = vpack.c.bf16 %v2098_v29, %v2097_v28 }
  0xcb   : > { %v454_v55 = vpop.f32.mrf.mxu2 }
  0xcc   : > { %v538_v57 = vpop.f32.mrf.mxu3  ;;  %v2670_v59 = vpop.f32.mrf.mxu0 }
  0xcd   : > { %v2672_v60 = vadd.f32 %v538_v57, %v454_v55  ;;  %v2165_v57 = vld [vmem:[%s2476_s19 + $0x26] sm:$0xff] }
  0xce   : > { %v2674_v61 = vpop.f32.mrf.mxu1  ;;  %v1361_v2 = vpack.c.bf16 %v2166_v62, %v2165_v57 }
  0xd3   : > { %v456_v4 = vpop.f32.mrf.mxu2 }
  0xd4   : > { %v540_v8 = vpop.f32.mrf.mxu3  ;;  %v434_v10 = vpop.f32.mrf.mxu0 }
  0xd5   : > { %v2684_v12 = vadd.f32 %v540_v8, %v456_v4 }
  0xd6   : > { %v518_v14 = vpop.f32.mrf.mxu1 }
  0xd7   : > { %v2686_v17 = vadd.f32 %v518_v14, %v434_v10  ;;  %2079 = vmatmul.msk.bf16.gmra.mxu0 %vm373_vm1, %v836_v7 }
  0xd8   : > { %2024 = vmatmul.msk.bf16.gmra.mxu2 %vm373_vm1, %v703_v53 }
  0xd9   : > { %2107 = vmatmul.msk.bf16.gmra.mxu1 %vm373_vm1, %v2682_v11  ;;  %2052 = vmatmul.msk.bf16.gmra.mxu3 %vm373_vm1, %v704_v16 }
  0xdb   : > { %v613_v19 = vpop.f32.mrf.mxu2 }
  0xdc   : > { %v658_v20 = vadd.f32 %v613_v19, %v2598_v52  ;;  %v746_v21 = vpop.f32.mrf.mxu3  ;;  %v2697_v22 = vpop.f32.mrf.mxu0 }
  0xde   : > { %v791_v23 = vadd.f32 %v746_v21, %v658_v20  ;;  %v2167_v20 = vld [vmem:[%s2476_s19 + $0x36] sm:$0xff]  ;;  %v2168_v21 = vld [vmem:[%s2476_s19 + $0x3e] sm:$0xff] }
  0xdf   : > { %v1362_v29 = vpack.c.bf16 %v2168_v21, %v2167_v20 }
  0xe3   : > { %v615_v37 = vpop.f32.mrf.mxu2 }
  0xe4   : > { %v659_v40 = vadd.f32 %v615_v37, %v2607_v58  ;;  %v748_v41 = vpop.f32.mrf.mxu3  ;;  %v879_v42 = vpop.f32.mrf.mxu0  ;;  %v1230_v37 = vpack.c.bf16 %v2142_v25, %v2141_v24 }
  0xe5   : > { %v2708_v52 = vadd.f32 %v879_v42, %v791_v23  ;;  %v511_v23 = vadd.f32 %v2651_v36, %v2647_v34 }
  0xe6   : > { %v792_v45 = vadd.f32 %v748_v41, %v659_v40 }
  0xe7   : > { %2080 = vmatmul.msk.bf16.gmra.mxu0 %vm373_vm1, %v837_v38 }
  0xe8   : > { %2128 = vmatmul.msk.bf16.vlgmr.msra.gmra.mxu2 %vm373_vm1, %v2570_v30 }
  0xe9   : > { %2108 = vmatmul.msk.bf16.gmra.mxu1 %vm373_vm1, %v2706_v43  ;;  %2156 = vmatmul.msk.bf16.vlgmr.msra.gmra.mxu3 %vm373_vm1, %v1228_v44 }
  0xeb   : > { %v618_v58 = vpop.f32.mrf.mxu2 }
  0xec   : > { %v660_v46 = vadd.f32 %v618_v58, %v2619_v9  ;;  %v751_v47 = vpop.f32.mrf.mxu3  ;;  %v881_v51 = vpop.f32.mrf.mxu0  ;;  %v1229_v9 = vpack.c.bf16 %v2140_v0, %v2139_v63  ;;  %v2170_v58 = vld [vmem:[%s2476_s19 + $0x4e] sm:$0xff] }
  0xed   : > { %v2717_v53 = vadd.f32 %v881_v51, %v792_v45  ;;  %v2169_v45 = vld [vmem:[%s2476_s19 + $0x46] sm:$0xff]  ;;  %v2144_v51 = vld [vmem:[%s2476_s19 + $0x5d] sm:$0xff] }
  0xee   : > { %v793_v55 = vadd.f32 %v751_v47, %v660_v46  ;;  %v516_v46 = vadd.f32 %v2674_v61, %v2670_v59  ;;  %v2143_v47 = vld [vmem:[%s2476_s19 + $0x55] sm:$0xff]  ;;  %v1363_v57 = vpack.c.bf16 %v2170_v58, %v2169_v45 }
  0xef   : > { %v1231_v0 = vpack.c.bf16 %v2144_v51, %v2143_v47 }
  0xf3   : > { %v620_v1 = vpop.f32.mrf.mxu2 }
  0xf4   : > { %v661_v30 = vadd.f32 %v620_v1, %v2628_v15  ;;  %v753_v3 = vpop.f32.mrf.mxu3  ;;  %v884_v4 = vpop.f32.mrf.mxu0 }
  0xf5   : > { %v2724_v7 = vadd.f32 %v884_v4, %v793_v55 }
  0xf6   : > { %v794_v8 = vadd.f32 %v753_v3, %v661_v30 }
  0xf7   : > { %2184 = vmatmul.msk.bf16.vlgmr.msra.gmra.mxu0 %vm373_vm1, %v1361_v2 }
  0xf8   : > { %2129 = vmatmul.msk.bf16.gmra.mxu2 %vm373_vm1, %v2583_v39 }
  0xf9   : > { %2157 = vmatmul.msk.bf16.gmra.mxu3 %vm373_vm1, %v1229_v9  ;;  %v2212_v9 = vld [vmem:[%s3077_s3] sm:$0xff] }
  0xfa   : > { %1578 = vmatpush.bf16.msra.mxu1 %v2212_v9 }
  0xfb   : > { %v623_v10 = vpop.f32.mrf.mxu2 }
  0xfc   : > { %v662_v14 = vadd.f32 %v623_v10, %v2640_v31  ;;  %v756_v15 = vpop.f32.mrf.mxu3  ;;  %v886_v16 = vpop.f32.mrf.mxu0  ;;  %v2171_v10 = vld [vmem:[%s2476_s19 + $0x56] sm:$0xff] }
  0xfd   : > { %v2731_v18 = vadd.f32 %v886_v16, %v794_v8  ;;  %v520_v8 = vpop.f32.mrf.mxu1  ;;  %v2146_v16 = vld [vmem:[%s2476_s19 + $0x6d] sm:$0xff] }
  0xfe   : > { %v795_v19 = vadd.f32 %v756_v15, %v662_v14  ;;  %v2172_v14 = vld [vmem:[%s2476_s19 + $0x5e] sm:$0xff] }
  0xff   : > { %v2145_v15 = vld [vmem:[%s2476_s19 + $0x65] sm:$0xff]  ;;  %v1364_v20 = vpack.c.bf16 %v2172_v14, %v2171_v10 }
 0x100   : > { %v1232_v25 = vpack.c.bf16 %v2146_v16, %v2145_v15 }
 0x103   : > { %v625_v28 = vpop.f32.mrf.mxu2 }
 0x104   : > { %v663_v39 = vadd.f32 %v625_v28, %v511_v23  ;;  %v758_v32 = vpop.f32.mrf.mxu3  ;;  %v889_v33 = vpop.f32.mrf.mxu0 }
 0x105   : > { %v2739_v31 = vadd.f32 %v889_v33, %v795_v19  ;;  %v1012_v10 = vpop.f32.mrf.mxu1 }
 0x106   : > { %v796_v38 = vadd.f32 %v758_v32, %v663_v39 }
 0x107   : > { %2185 = vmatmul.msk.bf16.gmra.mxu0 %vm373_vm1, %v1362_v29 }
 0x108   : > { %2130 = vmatmul.msk.bf16.gmra.mxu2 %vm373_vm1, %v2596_v49 }
 0x109   : > { %2158 = vmatmul.msk.bf16.gmra.mxu3 %vm373_vm1, %v1230_v37 }
 0x10b   : > { %v628_v34 = vpop.f32.mrf.mxu2 }
 0x10c   : > { %v664_v36 = vadd.f32 %v628_v34, %v2663_v54  ;;  %v761_v40 = vpop.f32.mrf.mxu3  ;;  %v891_v41 = vpop.f32.mrf.mxu0  ;;  %v2174_v34 = vld [vmem:[%s2476_s19 + $0x6e] sm:$0xff] }
 0x10d   : > { %v2746_v42 = vadd.f32 %v891_v41, %v796_v38  ;;  %v2173_v38 = vld [vmem:[%s2476_s19 + $0x66] sm:$0xff] }
 0x10e   : > { %v797_v44 = vadd.f32 %v761_v40, %v664_v36  ;;  %v2147_v36 = vld [vmem:[%s2476_s19 + $0x75] sm:$0xff]  ;;  %v2148_v40 = vld [vmem:[%s2476_s19 + $0x7d] sm:$0xff] }
 0x113   : > { %v630_v55 = vpop.f32.mrf.mxu2 }
 0x114   : > { %v665_v49 = vadd.f32 %v630_v55, %v516_v46  ;;  %v763_v62 = vpop.f32.mrf.mxu3  ;;  %v894_v63 = vpop.f32.mrf.mxu0  ;;  %v1233_v46 = vpack.c.bf16 %v2148_v40, %v2147_v36 }
 0x115   : > { %v2754_v54 = vadd.f32 %v894_v63, %v797_v44  ;;  %v1365_v44 = vpack.c.bf16 %v2174_v34, %v2173_v38  ;;  %v2175_v63 = vld [vmem:[%s2476_s19 + $0x76] sm:$0xff] }
 0x116   : > { %v798_v1 = vadd.f32 %v763_v62, %v665_v49 }
 0x117   : > { %2186 = vmatmul.msk.bf16.gmra.mxu0 %vm373_vm1, %v1363_v57 }
 0x118   : > { %2131 = vmatmul.msk.bf16.gmra.mxu2 %vm373_vm1, %v2615_v5  ;;  %v521_v5 = vadd.f32 %v520_v8, %v2697_v22 }
 0x119   : > { %2159 = vmatmul.msk.bf16.gmra.mxu3 %vm373_vm1, %v1231_v0  ;;  %v2176_v0 = vld [vmem:[%s2476_s19 + $0x7e] sm:$0xff] }
 0x11b   : > { %v633_v59 = vpop.f32.mrf.mxu2 }
 0x11c   : > { %v666_v61 = vadd.f32 %v633_v59, %v2686_v17  ;;  %v766_v2 = vpop.f32.mrf.mxu3  ;;  %v896_v30 = vpop.f32.mrf.mxu0  ;;  %v2150_v59 = vld [vmem:[%s2476_s19 + $0x8d] sm:$0xff] }
 0x11d   : > { %v2761_v3 = vadd.f32 %v896_v30, %v798_v1  ;;  %v2149_v1 = vld [vmem:[%s2476_s19 + $0x85] sm:$0xff] }
 0x11e   : > { %v799_v4 = vadd.f32 %v766_v2, %v666_v61  ;;  %v1366_v2 = vpack.c.bf16 %v2176_v0, %v2175_v63 }
 0x123   : > { %v635_v19 = vpop.f32.mrf.mxu2 }
 0x124   : > { %v667_v17 = vadd.f32 %v635_v19, %v521_v5  ;;  %v768_v21 = vpop.f32.mrf.mxu3  ;;  %v899_v23 = vpop.f32.mrf.mxu0 }
 0x125   : > { %v2771_v24 = vadd.f32 %v899_v23, %v799_v4  ;;  %v2151_v23 = vld [vmem:[%s2476_s19 + $0x95] sm:$0xff] }
 0x126   : > { %v800_v28 = vadd.f32 %v768_v21, %v667_v17  ;;  %v2178_v17 = vld [vmem:[%s2476_s19 + $0x8e] sm:$0xff]  ;;  %v1014_v21 = vpop.f32.mrf.mxu1 }
 0x127   : > { %2187 = vmatmul.msk.bf16.gmra.mxu0 %vm373_vm1, %v1364_v20  ;;  %v2177_v20 = vld [vmem:[%s2476_s19 + $0x86] sm:$0xff] }
 0x128   : > { %2132 = vmatmul.msk.bf16.gmra.mxu2 %vm373_vm1, %v2636_v26 }
 0x129   : > { %2160 = vmatmul.msk.bf16.gmra.mxu3 %vm373_vm1, %v1232_v25  ;;  %v2152_v25 = vld [vmem:[%s2476_s19 + $0x9d] sm:$0xff] }
 0x12b   : > { %v638_v22 = vpop.f32.mrf.mxu2 }
 0x12c   : > { %v668_v29 = vadd.f32 %v638_v22, %v2605_v56  ;;  %v771_v39 = vpop.f32.mrf.mxu3  ;;  %v901_v32 = vpop.f32.mrf.mxu0  ;;  %v1367_v22 = vpack.c.bf16 %v2178_v17, %v2177_v20  ;;  %v1058_v20 = vadd.f32 %v1014_v21, %v2717_v53 }
 0x12d   : > { %v2778_v33 = vadd.f32 %v901_v32, %v800_v28  ;;  %v1235_v32 = vpack.c.bf16 %v2152_v25, %v2151_v23 }
 0x12e   : > { %v801_v37 = vadd.f32 %v771_v39, %v668_v29 }
 0x133   : > { %v640_v41 = vpop.f32.mrf.mxu2 }
 0x134   : > { %v669_v45 = vadd.f32 %v640_v41, %v2617_v6  ;;  %v773_v26 = vpop.f32.mrf.mxu3  ;;  %v904_v58 = vpop.f32.mrf.mxu0 }
 0x135   : > { %v2785_v56 = vadd.f32 %v904_v58, %v801_v37  ;;  %v2125_v58 = vld [vmem:[%s2476_s19 + $0xa4] sm:$0xff] }
 0x136   : > { %v802_v47 = vadd.f32 %v773_v26, %v669_v45  ;;  %v2179_v45 = vld [vmem:[%s2476_s19 + $0x96] sm:$0xff]  ;;  %v2180_v26 = vld [vmem:[%s2476_s19 + $0x9e] sm:$0xff] }
 0x137   : > { %2188 = vmatmul.msk.bf16.gmra.mxu0 %vm373_vm1, %v1365_v44 }
 0x138   : > { %2133 = vmatmul.msk.bf16.gmra.mxu2 %vm373_vm1, %v2659_v48 }
 0x139   : > { %2161 = vmatmul.msk.bf16.gmra.mxu3 %vm373_vm1, %v1233_v46  ;;  %v2126_v46 = vld [vmem:[%s2476_s19 + $0xac] sm:$0xff] }
 0x13b   : > { %v643_v51 = vpop.f32.mrf.mxu2 }
 0x13c   : > { %v670_v55 = vadd.f32 %v643_v51, %v2626_v13  ;;  %v776_v6 = vpop.f32.mrf.mxu3  ;;  %v906_v57 = vpop.f32.mrf.mxu0  ;;  %v1234_v13 = vpack.c.bf16 %v2150_v59, %v2149_v1  ;;  %v2154_v51 = vld [vmem:[%s2476_s19 + $0xad] sm:$0xff] }
 0x13d   : > { %v2792_v49 = vadd.f32 %v906_v57, %v802_v47  ;;  %v2153_v47 = vld [vmem:[%s2476_s19 + $0xa5] sm:$0xff] }
 0x13e   : > { %v803_v62 = vadd.f32 %v776_v6, %v670_v55  ;;  %v1368_v6 = vpack.c.bf16 %v2180_v26, %v2179_v45  ;;  %v1236_v1 = vpack.c.bf16 %v2154_v51, %v2153_v47 }
 0x143   : > { %v645_v61 = vpop.f32.mrf.mxu2 }
 0x144   : > { %v671_v30 = vadd.f32 %v645_v61, %v2638_v27  ;;  %v778_v48 = vpop.f32.mrf.mxu3  ;;  %v909_v4 = vpop.f32.mrf.mxu0 }
 0x145   : > { %v2799_v9 = vadd.f32 %v909_v4, %v803_v62  ;;  %v2181_v4 = vld [vmem:[%s2476_s19 + $0xa6] sm:$0xff] }
 0x146   : > { %v804_v8 = vadd.f32 %v778_v48, %v671_v30 }
 0x147   : > { %2189 = vmatmul.msk.bf16.gmra.mxu0 %vm373_vm1, %v1366_v2 }
 0x148   : > { %2134 = vmatmul.msk.bf16.gmra.mxu2 %vm373_vm1, %v2682_v11 }
 0x149   : > { %2162 = vmatmul.msk.bf16.gmra.mxu3 %vm373_vm1, %v1234_v13  ;;  %v2182_v13 = vld [vmem:[%s2476_s19 + $0xae] sm:$0xff]  ;;  %s2381_s19 = smov 120  }
 0x14b   : > { %v648_v14 = vpop.f32.mrf.mxu2 }
 0x14c   : > { %v672_v27 = vadd.f32 %v648_v14, %v2649_v35  ;;  %v781_v5 = vpop.f32.mrf.mxu3  ;;  %v911_v15 = vpop.f32.mrf.mxu0 }
 0x14d   : > { %v2806_v16 = vadd.f32 %v911_v15, %v804_v8  ;;  %v1057_v8 = vadd.f32 %v1012_v10, %v2708_v52 }
 0x14e   : > { %v805_v19 = vadd.f32 %v781_v5, %v672_v27  ;;  %v1369_v5 = vpack.c.bf16 %v2182_v13, %v2181_v4 }
 0x153   : > { %v650_v28 = vpop.f32.mrf.mxu2 }
 0x154   : > { %v673_v29 = vadd.f32 %v650_v28, %v2661_v50  ;;  %v783_v11 = vpop.f32.mrf.mxu3  ;;  %v914_v39 = vpop.f32.mrf.mxu0 }
 0x155   : > { %v2813_v35 = vadd.f32 %v914_v39, %v805_v19  ;;  %v1017_v50 = vpop.f32.mrf.mxu1 }
 0x156   : > { %v806_v37 = vadd.f32 %v783_v11, %v673_v29  ;;  %v1059_v21 = vadd.f32 %v1017_v50, %v2724_v7 }
 0x157   : > { %2190 = vmatmul.msk.bf16.gmra.mxu0 %vm373_vm1, %v1367_v22  ;;  %v2844_v22 = vld [vmem:[%s3076_s2] ss:$0 sm:$0xff] }
 0x158   : > { %2135 = vmatmul.msk.bf16.gmra.mxu2 %vm373_vm1, %v2706_v43 }
 0x159   : > { %2163 = vmatmul.msk.bf16.gmra.mxu3 %vm373_vm1, %v1235_v32 }
 0x15b   : > { %v653_v38 = vpop.f32.mrf.mxu2 }
 0x15c   : > { %v674_v34 = vadd.f32 %v653_v38, %v2672_v60  ;;  %v786_v36 = vpop.f32.mrf.mxu3  ;;  %v916_v40 = vpop.f32.mrf.mxu0  ;;  %v1103_v60 = vpack.c.bf16 %v2126_v46, %v2125_v58 }
 0x15d   : > { %v2820_v41 = vadd.f32 %v916_v40, %v806_v37  ;;  %v1019_v63 = vpop.f32.mrf.mxu1 }
 0x15e   : > { %v807_v44 = vadd.f32 %v786_v36, %v674_v34  ;;  %v1060_v58 = vadd.f32 %v1019_v63, %v2731_v18 }
 0x163   : > { %v655_v55 = vpop.f32.mrf.mxu2 }
 0x164   : > { %v675_v43 = vadd.f32 %v655_v55, %v2684_v12  ;;  %v788_v57 = vpop.f32.mrf.mxu3  ;;  %v919_v62 = vpop.f32.mrf.mxu0 }
 0x165   : > { %v2829_v0 = vadd.f32 %v919_v62, %v807_v44  ;;  %v1022_v48 = vpop.f32.mrf.mxu1 }
 0x166   : > { %v808_v59 = vadd.f32 %v788_v57, %v675_v43 }
 0x167   : > { %2191 = vmatmul.msk.bf16.gmra.mxu0 %vm373_vm1, %v1368_v6 }
 0x168   : > { %2136 = vmatmul.msk.bf16.gmra.mxu2 %vm373_vm1, %v1103_v60 }
 0x169   : > { %2164 = vmatmul.msk.bf16.gmra.mxu3 %vm373_vm1, %v1236_v1  ;;  %v1061_v1 = vadd.f32 %v1022_v48, %v2739_v31 }
 0x16b   : > { %v1145_v61 = vpop.f32.mrf.mxu2 }
 0x16c   : > { %v1278_v2 = vpop.f32.mrf.mxu3  ;;  %v921_v30 = vpop.f32.mrf.mxu0  ;;  %v1190_v14 = vadd.f32 %v1145_v61, %v1057_v8 }
 0x16d   : > { %v2834_v12 = vadd.f32 %v921_v30, %v808_v59  ;;  %v1024_v25 = vpop.f32.mrf.mxu1 }
 0x16e   : > { %v1323_v17 = vadd.f32 %v1278_v2, %v1190_v14  ;;  %v1062_v13 = vadd.f32 %v1024_v25, %v2746_v42 }
 0x173   : > { %v1147_v27 = vpop.f32.mrf.mxu2 }
 0x174   : > { %v1280_v15 = vpop.f32.mrf.mxu3  ;;  %v1411_v19 = vpop.f32.mrf.mxu0  ;;  %v1191_v23 = vadd.f32 %v1147_v27, %v1058_v20 }
 0x175   : > { %v1456_v28 = vadd.f32 %v1411_v19, %v1323_v17  ;;  %v1027_v34 = vpop.f32.mrf.mxu1 }
 0x176   : > { %v1324_v29 = vadd.f32 %v1280_v15, %v1191_v23 }
 0x177   : > { %2192 = vmatmul.msk.bf16.gmra.mxu0 %vm373_vm1, %v1369_v5  ;;  %v1478_v39 = vadd.f32 %v2844_v22, %v1456_v28  ;;  %v1063_v28 = vadd.f32 %v1027_v34, %v2754_v54 }
 0x179   : > { %v1496_v37 = vmax.f32 %v1478_v39, 0.0 }
 0x17b   : > { %v1150_v52 = vpop.f32.mrf.mxu2 }
 0x17c   : > { %v1283_v10 = vpop.f32.mrf.mxu3  ;;  %v1413_v11 = vpop.f32.mrf.mxu0  ;;  %v1192_v36 = vadd.f32 %v1150_v52, %v1059_v21 }
 0x17d   : > { %v1457_v32 = vadd.f32 %v1413_v11, %v1324_v29  ;;  %v1029_v50 = vpop.f32.mrf.mxu1 }
 0x17e   : > { %v1325_v46 = vadd.f32 %v1283_v10, %v1192_v36 }
 0x17f   : > { %v1479_v53 = vadd.f32 %v2844_v22, %v1457_v32 }
 0x181   : > { %v1497_v38 = vmax.f32 %v1479_v53, 0.0  ;;  %v1064_v53 = vadd.f32 %v1029_v50, %v2761_v3 }
 0x183   : > { %v1514_v40 = vpack.c.bf16 %v1497_v38, %v1496_v37  ;;  %v1152_v44 = vpop.f32.mrf.mxu2 }
 0x184   : > { %v1285_v45 = vpop.f32.mrf.mxu3  ;;  %v1416_v26 = vpop.f32.mrf.mxu0  ;;  %v1193_v47 = vadd.f32 %v1152_v44, %v1060_v58 }
 0x185   : > { %2201 = vmatmul.msk.bf16.vlgmr.msra.gmra.mxu1 %vm1543_vm2, %v1514_v40  ;;  %v1458_v51 = vadd.f32 %v1416_v26, %v1325_v46  ;;  %v1032_v8 = vpop.f32.mrf.mxu1 }
 0x186   : > { %v1326_v55 = vadd.f32 %v1285_v45, %v1193_v47  ;;  %v1065_v46 = vadd.f32 %v1032_v8, %v2771_v24 }
 0x187   : > { %v1480_v57 = vadd.f32 %v2844_v22, %v1458_v51 }
 0x189   : > { %v1498_v59 = vmax.f32 %v1480_v57, 0.0 }
 0x18b   : > { %v1155_v6 = vpop.f32.mrf.mxu2 }
 0x18c   : > { %v1288_v43 = vpop.f32.mrf.mxu3  ;;  %v1418_v7 = vpop.f32.mrf.mxu0  ;;  %v1194_v18 = vadd.f32 %v1155_v6, %v1061_v1 }
 0x18d   : > { %v1459_v62 = vadd.f32 %v1418_v7, %v1326_v55  ;;  %v1034_v29 = vpop.f32.mrf.mxu1 }
 0x18e   : > { %v1327_v14 = vadd.f32 %v1288_v43, %v1194_v18  ;;  %v1066_v50 = vadd.f32 %v1034_v29, %v2778_v33 }
 0x18f   : > { %v1481_v60 = vadd.f32 %v2844_v22, %v1459_v62 }
 0x191   : > { %v1499_v61 = vmax.f32 %v1481_v60, 0.0 }
 0x193   : > { %v1515_v63 = vpack.c.bf16 %v1499_v61, %v1498_v59  ;;  %v1157_v2 = vpop.f32.mrf.mxu2 }
 0x194   : > { %v1290_v30 = vpop.f32.mrf.mxu3  ;;  %v1421_v4 = vpop.f32.mrf.mxu0  ;;  %v1195_v27 = vadd.f32 %v1157_v2, %v1062_v13 }
 0x195   : > { %2202 = vmatmul.msk.bf16.gmra.mxu1 %vm1543_vm2, %v1515_v63  ;;  %v1460_v5 = vadd.f32 %v1421_v4, %v1327_v14  ;;  %v1037_v36 = vpop.f32.mrf.mxu1 }
 0x196   : > { %v1328_v15 = vadd.f32 %v1290_v30, %v1195_v27  ;;  %v1067_v13 = vadd.f32 %v1037_v36, %v2785_v56 }
 0x197   : > { %v1482_v31 = vadd.f32 %v2844_v22, %v1460_v5 }
 0x199   : > { %v1500_v52 = vmax.f32 %v1482_v31, 0.0 }
 0x19b   : > { %v1160_v19 = vpop.f32.mrf.mxu2 }
 0x19c   : > { %v1293_v20 = vpop.f32.mrf.mxu3  ;;  %v1423_v17 = vpop.f32.mrf.mxu0  ;;  %v1196_v25 = vadd.f32 %v1160_v19, %v1063_v28 }
 0x19d   : > { %v1461_v48 = vadd.f32 %v1423_v17, %v1328_v15  ;;  %v1039_v57 = vpop.f32.mrf.mxu1 }
 0x19e   : > { %v1329_v21 = vadd.f32 %v1293_v20, %v1196_v25  ;;  %v1068_v20 = vadd.f32 %v1039_v57, %v2792_v49 }
 0x19f   : > { %v1483_v23 = vadd.f32 %v2844_v22, %v1461_v48 }
 0x1a1   : > { %v1501_v42 = vmax.f32 %v1483_v23, 0.0 }
 0x1a3   : > { %v1516_v10 = vpack.c.bf16 %v1501_v42, %v1500_v52  ;;  %v1162_v11 = vpop.f32.mrf.mxu2 }
 0x1a4   : > { %v1295_v39 = vpop.f32.mrf.mxu3  ;;  %v1426_v32 = vpop.f32.mrf.mxu0  ;;  %v1197_v37 = vadd.f32 %v1162_v11, %v1064_v53 }
 0x1a5   : > { %2203 = vmatmul.msk.bf16.gmra.mxu1 %vm1543_vm2, %v1516_v10  ;;  %v1462_v38 = vadd.f32 %v1426_v32, %v1329_v21  ;;  %v1042_v30 = vpop.f32.mrf.mxu1 }
 0x1a6   : > { %v1330_v40 = vadd.f32 %v1295_v39, %v1197_v37  ;;  %v1069_v11 = vadd.f32 %v1042_v30, %v2799_v9 }
 0x1a7   : > { %v1484_v34 = vadd.f32 %v2844_v22, %v1462_v38 }
 0x1a9   : > { %v1502_v47 = vmax.f32 %v1484_v34, 0.0 }
 0x1ab   : > { %v1165_v44 = vpop.f32.mrf.mxu2 }
 0x1ac   : > { %v1298_v45 = vpop.f32.mrf.mxu3  ;;  %v1428_v54 = vpop.f32.mrf.mxu0  ;;  %v1198_v3 = vadd.f32 %v1165_v44, %v1065_v46 }
 0x1ad   : > { %v1463_v26 = vadd.f32 %v1428_v54, %v1330_v40  ;;  %v1044_v48 = vpop.f32.mrf.mxu1 }
 0x1ae   : > { %v1331_v62 = vadd.f32 %v1298_v45, %v1198_v3  ;;  %v1070_v40 = vadd.f32 %v1044_v48, %v2806_v16 }
 0x1af   : > { %v1485_v58 = vadd.f32 %v2844_v22, %v1463_v26 }
 0x1b1   : > { %v1503_v51 = vmax.f32 %v1485_v58, 0.0 }
 0x1b3   : > { %v1517_v55 = vpack.c.bf16 %v1503_v51, %v1502_v47  ;;  %v1167_v6 = vpop.f32.mrf.mxu2 }
 0x1b4   : > { %v1300_v43 = vpop.f32.mrf.mxu3  ;;  %v1431_v7 = vpop.f32.mrf.mxu0  ;;  %v1199_v60 = vadd.f32 %v1167_v6, %v1066_v50 }
 0x1b5   : > { %2204 = vmatmul.msk.bf16.gmra.mxu1 %vm1543_vm2, %v1517_v55  ;;  %v1464_v1 = vadd.f32 %v1431_v7, %v1331_v62  ;;  %v1047_v49 = vpop.f32.mrf.mxu1 }
 0x1b6   : > { %v1332_v59 = vadd.f32 %v1300_v43, %v1199_v60  ;;  %v1071_v55 = vadd.f32 %v1047_v49, %v2813_v35 }
 0x1b7   : > { %v1486_v24 = vadd.f32 %v2844_v22, %v1464_v1 }
 0x1b9   : > { %v1504_v8 = vmax.f32 %v1486_v24, 0.0 }
 0x1bb   : > { %v1170_v61 = vpop.f32.mrf.mxu2 }
 0x1bc   : > { %v1303_v18 = vpop.f32.mrf.mxu3  ;;  %v1433_v63 = vpop.f32.mrf.mxu0  ;;  %v1200_v14 = vadd.f32 %v1170_v61, %v1067_v13 }
 0x1bd   : > { %v1465_v2 = vadd.f32 %v1433_v63, %v1332_v59  ;;  %v1049_v51 = vpop.f32.mrf.mxu1 }
 0x1be   : > { %v1333_v17 = vadd.f32 %v1303_v18, %v1200_v14  ;;  %v1072_v62 = vadd.f32 %v1049_v51, %v2820_v41 }
 0x1bf   : > { %v1487_v4 = vadd.f32 %v2844_v22, %v1465_v2 }
 0x1c1   : > { %v1505_v33 = vmax.f32 %v1487_v4, 0.0 }
 0x1c3   : > { %v1518_v27 = vpack.c.bf16 %v1505_v33, %v1504_v8  ;;  %v1172_v5 = vpop.f32.mrf.mxu2 }
 0x1c4   : > { %v1305_v15 = vpop.f32.mrf.mxu3  ;;  %v1436_v19 = vpop.f32.mrf.mxu0  ;;  %v1201_v31 = vadd.f32 %v1172_v5, %v1068_v20 }
 0x1c5   : > { %2205 = vmatmul.msk.bf16.gmra.mxu1 %vm1543_vm2, %v1518_v27  ;;  %v1466_v23 = vadd.f32 %v1436_v19, %v1333_v17  ;;  %v1052_v61 = vpop.f32.mrf.mxu1 }
 0x1c6   : > { %v1334_v28 = vadd.f32 %v1305_v15, %v1201_v31  ;;  %v1073_v8 = vadd.f32 %v1052_v61, %v2829_v0 }
 0x1c7   : > { %v1488_v56 = vadd.f32 %v2844_v22, %v1466_v23 }
 0x1c9   : > { %v1506_v39 = vmax.f32 %v1488_v56, 0.0  ;;  %v2891_v56 = vld [vmem:[%s3078_s4] ss:$0 sm:$0xff] }
 0x1cb   : > { %v1175_v29 = vpop.f32.mrf.mxu2 }
 0x1cc   : > { %v1308_v52 = vpop.f32.mrf.mxu3  ;;  %v1438_v42 = vpop.f32.mrf.mxu0  ;;  %v1202_v53 = vadd.f32 %v1175_v29, %v1069_v11 }
 0x1cd   : > { %v1467_v25 = vadd.f32 %v1438_v42, %v1334_v28  ;;  %v1054_v14 = vpop.f32.mrf.mxu1 }
 0x1ce   : > { %v1335_v44 = vadd.f32 %v1308_v52, %v1202_v53  ;;  %v1074_v20 = vadd.f32 %v1054_v14, %v2834_v12 }
 0x1cf   : > { %v1489_v10 = vadd.f32 %v2844_v22, %v1467_v25 }
 0x1d1   : > { %v1507_v32 = vmax.f32 %v1489_v10, 0.0 }
 0x1d3   : > { %v1519_v21 = vpack.c.bf16 %v1507_v32, %v1506_v39  ;;  %v1177_v37 = vpop.f32.mrf.mxu2 }
 0x1d4   : > { %v1310_v38 = vpop.f32.mrf.mxu3  ;;  %v1441_v36 = vpop.f32.mrf.mxu0  ;;  %v1203_v45 = vadd.f32 %v1177_v37, %v1070_v40 }
 0x1d5   : > { %2206 = vmatmul.msk.bf16.gmra.mxu1 %vm1543_vm2, %v1519_v21  ;;  %v1468_v54 = vadd.f32 %v1441_v36, %v1335_v44 }
 0x1d6   : > { %v1336_v34 = vadd.f32 %v1310_v38, %v1203_v45 }
 0x1d7   : > { %v1490_v9 = vadd.f32 %v2844_v22, %v1468_v54 }
 0x1d9   : > { %v1508_v6 = vmax.f32 %v1490_v9, 0.0 }
 0x1db   : > { %v1180_v26 = vpop.f32.mrf.mxu2 }
 0x1dc   : > { %v1313_v58 = vpop.f32.mrf.mxu3  ;;  %v1443_v46 = vpop.f32.mrf.mxu0  ;;  %v1204_v16 = vadd.f32 %v1180_v26, %v1071_v55 }
 0x1dd   : > { %v1469_v47 = vadd.f32 %v1443_v46, %v1336_v34 }
 0x1de   : > { %v1337_v1 = vadd.f32 %v1313_v58, %v1204_v16 }
 0x1df   : > { %v1491_v3 = vadd.f32 %v2844_v22, %v1469_v47 }
 0x1e1   : > { %v1509_v43 = vmax.f32 %v1491_v3, 0.0 }
 0x1e3   : > { %v1520_v7 = vpack.c.bf16 %v1509_v43, %v1508_v6  ;;  %v1182_v50 = vpop.f32.mrf.mxu2 }
 0x1e4   : > { %v1446_v57 = vpop.f32.mrf.mxu0  ;;  %v1315_v60 = vpop.f32.mrf.mxu3  ;;  %v1205_v59 = vadd.f32 %v1182_v50, %v1072_v62 }
 0x1e5   : > { %2207 = vmatmul.msk.bf16.gmra.mxu1 %vm1543_vm2, %v1520_v7  ;;  %v1470_v18 = vadd.f32 %v1446_v57, %v1337_v1 }
 0x1e6   : > { %v1338_v63 = vadd.f32 %v1315_v60, %v1205_v59 }
 0x1e7   : > { %v1492_v35 = vadd.f32 %v2844_v22, %v1470_v18 }
 0x1e9   : > { %v1510_v33 = vmax.f32 %v1492_v35, 0.0 }
 0x1eb   : > { %v1185_v24 = vpop.f32.mrf.mxu2 }
 0x1ec   : > { %v1448_v2 = vpop.f32.mrf.mxu0  ;;  %v1318_v13 = vpop.f32.mrf.mxu3  ;;  %v1206_v27 = vadd.f32 %v1185_v24, %v1073_v8 }
 0x1ed   : > { %v1471_v30 = vadd.f32 %v1448_v2, %v1338_v63 }
 0x1ee   : > { %v1339_v17 = vadd.f32 %v1318_v13, %v1206_v27 }
 0x1ef   : > { %v1493_v4 = vadd.f32 %v2844_v22, %v1471_v30 }
 0x1f1   : > { %v1511_v41 = vmax.f32 %v1493_v4, 0.0 }
 0x1f3   : > { %v1521_v5 = vpack.c.bf16 %v1511_v41, %v1510_v33  ;;  %v1187_v15 = vpop.f32.mrf.mxu2 }
 0x1f4   : > { %v1451_v19 = vpop.f32.mrf.mxu0  ;;  %v1207_v31 = vadd.f32 %v1187_v15, %v1074_v20  ;;  %v1320_v23 = vpop.f32.mrf.mxu3 }
 0x1f5   : > { %2208 = vmatmul.msk.bf16.gmra.mxu1 %vm1543_vm2, %v1521_v5  ;;  %v1472_v48 = vadd.f32 %v1451_v19, %v1339_v17 }
 0x1f6   : > { %v1340_v28 = vadd.f32 %v1320_v23, %v1207_v31 }
 0x1f7   : > { %v1494_v52 = vadd.f32 %v2844_v22, %v1472_v48 }
 0x1f9   : > { %v1512_v25 = vmax.f32 %v1494_v52, 0.0 }
 0x1fc   : > { %v1453_v29 = vpop.f32.mrf.mxu0 }
 0x1fd   : > { %v1473_v0 = vadd.f32 %v1453_v29, %v1340_v28 }
 0x1ff   : > { %v1495_v42 = vadd.f32 %v2844_v22, %v1473_v0 }
 0x201   : > { %v1513_v12 = vmax.f32 %v1495_v42, 0.0 }
 0x202   : > { %v1580_v10 = vpop.f32.mrf.mxu1 }
 0x203   : > { %v1522_v11 = vpack.c.bf16 %v1513_v12, %v1512_v25  ;;  %v2894_v39 = vadd.f32 %v2891_v56, %v1580_v10  ;;  %v2215_v25 = vld [vmem:[%s2973_s8] sm:$0xff]  }
 0x205   : > { %v1625_v32 = vmul.f32 1.442695, %v2894_v39  ;;  %2209 = vmatmul.msk.bf16.gmra.mxu1 %vm1543_vm2, %v1522_v11 }
 0x207   : > { %2305 = vpow2.f32 %v1625_v32  ;;  %v2216_v32 = vunpack.c.l.bf16 %v2215_v25 }
 0x20a   : > { %v1582_v49 = vpop.f32.mrf.mxu1 }
 0x20b   : > { %v2899_v22 = vadd.f32 %v2891_v56, %v1582_v49 }
 0x20d   : > { %v2306_v53 = vpop.eup %2305  ;;  %v1627_v21 = vmul.f32 1.442695, %v2899_v22 }
 0x20e   : > { %1715 = vrot.lane.b32.xlu0 %v2306_v53, %s2381_s19 }
 0x20f   : > { %2307 = vpow2.f32 %v1627_v21 }
 0x212   : > { %v1585_v37 = vpop.f32.mrf.mxu1 }
 0x213   : > { %v2904_v38 = vadd.f32 %v2891_v56, %v1585_v37  ;;  %v2251_v37 = vld [vmem:[%s2973_s8 + $0x10] sm:$0xff]  }
 0x215   : > { %v2308_v36 = vpop.eup %2307  ;;  %v1629_v40 = vmul.f32 1.442695, %v2904_v38 }
 0x216   : > { %1717 = vrot.lane.b32.xlu0 %v2308_v36, %s2381_s19 }
 0x217   : > { %2309 = vpow2.f32 %v1629_v40 }
 0x21a   : > { %v1587_v44 = vpop.f32.mrf.mxu1 }
 0x21b   : > { %v2909_v45 = vadd.f32 %v2891_v56, %v1587_v44 }
 0x21d   : > { %v2310_v54 = vpop.eup %2309  ;;  %v1631_v34 = vmul.f32 1.442695, %v2909_v45 }
 0x21e   : > { %1719 = vrot.lane.b32.xlu1 %v2310_v54, %s2381_s19 }
 0x21f   : > { %2311 = vpow2.f32 %v1631_v34  ;;  %v2224_v34 = vunpack.c.l.bf16 %v2251_v37 }
 0x222   : > { %v1590_v26 = vpop.f32.mrf.mxu1 }
 0x223   : > { %v2914_v58 = vadd.f32 %v2891_v56, %v1590_v26  ;;  %v2217_v26 = vunpack.c.h.bf16 %v2215_v25 }
 0x225   : > { %v2312_v46 = vpop.eup %2311  ;;  %v1633_v9 = vmul.f32 1.442695, %v2914_v58 }
 0x226   : > { %1721 = vrot.lane.b32.xlu1 %v2312_v46, %s2381_s19 }
 0x227   : > { %2313 = vpow2.f32 %v1633_v9 }
 0x22a   : > { %v1592_v47 = vpop.f32.mrf.mxu1 }
 0x22b   : > { %v2919_v51 = vadd.f32 %v2891_v56, %v1592_v47 }
 0x22d   : > { %v2314_v3 = vpop.eup %2313  ;;  %v1635_v55 = vmul.f32 1.442695, %v2919_v51 }
 0x22e   : > { %1723 = vrot.lane.b32.xlu2 %v2314_v3, %s2381_s19 }
 0x22f   : > { %2315 = vpow2.f32 %v1635_v55  ;;  %v2250_v55 = vld [vmem:[%s2973_s8 + $0x8] sm:$0xff]  }
 0x232   : > { %v1595_v6 = vpop.f32.mrf.mxu1 }
 0x233   : > { %v2924_v43 = vadd.f32 %v2891_v56, %v1595_v6 }
 0x235   : > { %v2316_v16 = vpop.eup %2315  ;;  %v1637_v7 = vmul.f32 1.442695, %v2924_v43 }
 0x236   : > { %1725 = vrot.lane.b32.xlu2 %v2316_v16, %s2381_s19 }
 0x237   : > { %2317 = vpow2.f32 %v1637_v7 }
 0x23a   : > { %v1597_v50 = vpop.f32.mrf.mxu1 }
 0x23b   : > { %v2929_v57 = vadd.f32 %v2891_v56, %v1597_v50 }
 0x23d   : > { %v2318_v62 = vpop.eup %2317  ;;  %v1639_v60 = vmul.f32 1.442695, %v2929_v57 }
 0x23e   : > { %1727 = vrot.lane.b32.xlu0 %v2318_v62, %s2381_s19 }
 0x23f   : > { %2319 = vpow2.f32 %v1639_v60  ;;  %v2225_v60 = vunpack.c.h.bf16 %v2251_v37  ;;  %v2256_v37 = vld [vmem:[%s2973_s8 + $0x38] sm:$0xff]  }
 0x242   : > { %v1600_v1 = vpop.f32.mrf.mxu1 }
 0x243   : > { %v2934_v59 = vadd.f32 %v2891_v56, %v1600_v1  ;;  %v2220_v1 = vunpack.c.l.bf16 %v2250_v55 }
 0x245   : > { %v2320_v61 = vpop.eup %2319  ;;  %v1641_v18 = vmul.f32 1.442695, %v2934_v59 }
 0x246   : > { %1729 = vrot.lane.b32.xlu1 %v2320_v61, %s2381_s19 }
 0x247   : > { %2321 = vpow2.f32 %v1641_v18 }
 0x24a   : > { %v1602_v63 = vpop.f32.mrf.mxu1 }
 0x24b   : > { %v2939_v24 = vadd.f32 %v2891_v56, %v1602_v63 }
 0x24d   : > { %v2322_v2 = vpop.eup %2321  ;;  %v1643_v35 = vmul.f32 1.442695, %v2939_v24 }
 0x24e   : > { %1731 = vrot.lane.b32.xlu2 %v2322_v2, %s2381_s19 }
 0x24f   : > { %2323 = vpow2.f32 %v1643_v35  ;;  %v2221_v35 = vunpack.c.h.bf16 %v2250_v55  ;;  %v2257_v55 = vld [vmem:[%s2973_s8 + $0x40] sm:$0xff]  }
 0x252   : > { %v1605_v30 = vpop.f32.mrf.mxu1 }
 0x253   : > { %v2944_v4 = vadd.f32 %v2891_v56, %v1605_v30 }
 0x255   : > { %v2324_v13 = vpop.eup %2323  ;;  %v1645_v8 = vmul.f32 1.442695, %v2944_v4 }
 0x256   : > { %1733 = vrot.lane.b32.xlu0 %v2324_v13, %s2381_s19 }
 0x257   : > { %2325 = vpow2.f32 %v1645_v8 }
 0x25a   : > { %v1607_v33 = vpop.f32.mrf.mxu1 }
 0x25b   : > { %v2949_v41 = vadd.f32 %v2891_v56, %v1607_v33 }
 0x25d   : > { %v2326_v14 = vpop.eup %2325  ;;  %v1647_v27 = vmul.f32 1.442695, %v2949_v41 }
 0x25e   : > { %1735 = vrot.lane.b32.xlu1 %v2326_v14, %s2381_s19 }
 0x25f   : > { %2327 = vpow2.f32 %v1647_v27  ;;  %v2252_v27 = vld [vmem:[%s2973_s8 + $0x18] sm:$0xff]  }
 0x262   : > { %v1610_v5 = vpop.f32.mrf.mxu1 }
 0x263   : > { %v2954_v15 = vadd.f32 %v2891_v56, %v1610_v5 }
 0x265   : > { %v2328_v19 = vpop.eup %2327  ;;  %v1649_v20 = vmul.f32 1.442695, %v2954_v15 }
 0x266   : > { %1737 = vrot.lane.b32.xlu2 %v2328_v19, %s2381_s19  ;;  %v2228_v19 = vunpack.c.l.bf16 %v2252_v27 }
 0x267   : > { %2329 = vpow2.f32 %v1649_v20 }
 0x26a   : > { %v1612_v17 = vpop.f32.mrf.mxu1 }
 0x26b   : > { %v2960_v31 = vadd.f32 %v2891_v56, %v1612_v17 }
 0x26d   : > { %v2330_v48 = vpop.eup %2329  ;;  %v1651_v23 = vmul.f32 1.442695, %v2960_v31 }
 0x26e   : > { %1739 = vrot.lane.b32.xlu0 %v2330_v48, %s2381_s19 }
 0x26f   : > { %2331 = vpow2.f32 %v1651_v23 }
 0x272   : > { %v1615_v28 = vpop.f32.mrf.mxu1 }
 0x273   : > { %v2966_v29 = vadd.f32 %v2891_v56, %v1615_v28 }
 0x275   : > { %v2332_v52 = vpop.eup %2331  ;;  %v1653_v0 = vmul.f32 1.442695, %v2966_v29 }
 0x276   : > { %1741 = vrot.lane.b32.xlu1 %v2332_v52, %s2381_s19  ;;  %v2254_v52 = vld [vmem:[%s2973_s8 + $0x28] sm:$0xff]  }
 0x277   : > { %2333 = vpow2.f32 %v1653_v0 }
 0x27a   : > { %v1617_v42 = vpop.f32.mrf.mxu1 }
 0x27b   : > { %v2977_v12 = vadd.f32 %v2891_v56, %v1617_v42 }
 0x27d   : > { %v2334_v10 = vpop.eup %2333  ;;  %v1655_v11 = vmul.f32 1.442695, %v2977_v12 }
 0x27e   : > { %1743 = vrot.lane.b32.xlu2 %v2334_v10, %s2381_s19 }
 0x27f   : > { %2335 = vpow2.f32 %v1655_v11 }
 0x280   : > { %v1716_v49 = vpop.permute.xlu0 %1715 }
 0x281   : > { %v1769_v53 = vmul.f32 %v2216_v32, %v1716_v49 }
 0x282   : > { %v1620_v21 = vpop.f32.mrf.mxu1 }
 0x283   : > { %v1787_v36 = vadd.f32 %v1769_v53, %v2894_v39  ;;  %v2989_v40 = vadd.f32 %v2891_v56, %v1620_v21 }
 0x285   : > { %v2336_v44 = vpop.eup %2335  ;;  %1806 = vst.msk [vmem:[%s2984_s11] sm:$0xff] %vm1805_vm3, %v1787_v36  ;;  %v1657_v54 = vmul.f32 1.442695, %v2989_v40 }
 0x286   : > { %1745 = vrot.lane.b32.xlu0 %v2336_v44, %s2381_s19 }
 0x287   : > { %2337 = vpow2.f32 %v1657_v54 }
 0x288   : > { %v1724_v46 = vpop.permute.xlu2 %1723  ;;  %v1718_v9 = vpop.permute.xlu0 %1717 }
 0x289   : > { %v1773_v47 = vmul.f32 %v2224_v34, %v1724_v46  ;;  %v1770_v3 = vmul.f32 %v2217_v26, %v1718_v9  ;;  %v2255_v34 = vld [vmem:[%s2973_s8 + $0x30] sm:$0xff]  }
 0x28a   : > { %v1622_v39 = vpop.f32.mrf.mxu1 }
 0x28b   : > { %v1791_v6 = vadd.f32 %v1773_v47, %v2914_v58  ;;  %v1788_v16 = vadd.f32 %v1770_v3, %v2899_v22  ;;  %v2999_v7 = vadd.f32 %v2891_v56, %v1622_v39 }
 0x28d   : > { %v2338_v50 = vpop.eup %2337  ;;  %1810 = vst.msk [vmem:[%s2984_s11 + $0x20] sm:$0xff] %vm1805_vm3, %v1791_v6  ;;  %v1659_v62 = vmul.f32 1.442695, %v2999_v7 }
 0x28e   : > { %1807 = vst.msk [vmem:[%s2984_s11 + $0x8] sm:$0xff] %vm1805_vm3, %v1788_v16  ;;  %1747 = vrot.lane.b32.xlu1 %v2338_v50, %s2381_s19 }
 0x28f   : > { %2339 = vpow2.f32 %v1659_v62 }
 0x290   : > { %v1726_v22 = vpop.permute.xlu2 %1725  ;;  %v1720_v58 = vpop.permute.xlu1 %1719 }
 0x291   : > { %v1774_v56 = vmul.f32 %v2225_v60, %v1726_v22  ;;  %v1771_v61 = vmul.f32 %v2220_v1, %v1720_v58  ;;  %v2248_v58 = vunpack.c.l.bf16 %v2257_v55 }
 0x293   : > { %v1792_v18 = vadd.f32 %v1774_v56, %v2919_v51  ;;  %v1789_v63 = vadd.f32 %v1771_v61, %v2904_v38  ;;  %v2253_v51 = vld [vmem:[%s2973_s8 + $0x20] sm:$0xff]  }
 0x294   : > { %v2232_v33 = vunpack.c.l.bf16 %v2253_v51 }
 0x295   : > { %v2340_v2 = vpop.eup %2339  ;;  %1811 = vst.msk [vmem:[%s2984_s11 + $0x28] sm:$0xff] %vm1805_vm3, %v1792_v18 }
 0x296   : > { %1808 = vst.msk [vmem:[%s2984_s11 + $0x10] sm:$0xff] %vm1805_vm3, %v1789_v63  ;;  %1749 = vrot.lane.b32.xlu2 %v2340_v2, %s2381_s19 }
 0x298   : > { %v1722_v30 = vpop.permute.xlu1 %1721 }
 0x299   : > { %v1772_v13 = vmul.f32 %v2221_v35, %v1722_v30 }
 0x29b   : > { %v1790_v8 = vadd.f32 %v1772_v13, %v2909_v45  ;;  %v2229_v45 = vunpack.c.h.bf16 %v2252_v27 }
 0x29d   : > { %1809 = vst.msk [vmem:[%s2984_s11 + $0x18] sm:$0xff] %vm1805_vm3, %v1790_v8 }
 0x2a8   : > { %v1732_v38 = vpop.permute.xlu2 %1731 }
 0x2a9   : > { %v1777_v14 = vmul.f32 %v2232_v33, %v1732_v38 }
 0x2ab   : > { %v1795_v5 = vadd.f32 %v1777_v14, %v2934_v59  ;;  %v2237_v59 = vunpack.c.h.bf16 %v2254_v52 }
 0x2ad   : > { %1814 = vst.msk [vmem:[%s2984_s11 + $0x40] sm:$0xff] %vm1805_vm3, %v1795_v5 }
 0x2b0   : > { %v1728_v20 = vpop.permute.xlu0 %1727 }
 0x2b1   : > { %v1775_v17 = vmul.f32 %v2228_v19, %v1728_v20 }
 0x2b3   : > { %v1793_v48 = vadd.f32 %v1775_v17, %v2924_v43  ;;  %v2233_v43 = vunpack.c.h.bf16 %v2253_v51 }
 0x2b5   : > { %1812 = vst.msk [vmem:[%s2984_s11 + $0x30] sm:$0xff] %vm1805_vm3, %v1793_v48 }
 0x2b8   : > { %v1730_v23 = vpop.permute.xlu1 %1729 }
 0x2b9   : > { %v1776_v28 = vmul.f32 %v2229_v45, %v1730_v23 }
 0x2bb   : > { %v1794_v0 = vadd.f32 %v1776_v28, %v2929_v57  ;;  %v2236_v57 = vunpack.c.l.bf16 %v2254_v52 }
 0x2bd   : > { %1813 = vst.msk [vmem:[%s2984_s11 + $0x38] sm:$0xff] %vm1805_vm3, %v1794_v0 }
 0x2c0   : > { %v1738_v42 = vpop.permute.xlu2 %1737 }
 0x2c1   : > { %v1780_v25 = vmul.f32 %v2237_v59, %v1738_v42 }
 0x2c3   : > { %v1798_v10 = vadd.f32 %v1780_v25, %v2949_v41  ;;  %v2244_v41 = vunpack.c.l.bf16 %v2256_v37 }
 0x2c5   : > { %1817 = vst.msk [vmem:[%s2984_s11 + $0x58] sm:$0xff] %vm1805_vm3, %v1798_v10 }
 0x2c8   : > { %v1734_v11 = vpop.permute.xlu0 %1733 }
 0x2c9   : > { %v1778_v32 = vmul.f32 %v2233_v43, %v1734_v11 }
 0x2cb   : > { %v1796_v49 = vadd.f32 %v1778_v32, %v2939_v24  ;;  %v2240_v24 = vunpack.c.l.bf16 %v2255_v34 }
 0x2cd   : > { %1815 = vst.msk [vmem:[%s2984_s11 + $0x48] sm:$0xff] %vm1805_vm3, %v1796_v49 }
 0x2d0   : > { %v1736_v53 = vpop.permute.xlu1 %1735 }
 0x2d1   : > { %v1779_v21 = vmul.f32 %v2236_v57, %v1736_v53 }
 0x2d3   : > { %v1797_v36 = vadd.f32 %v1779_v21, %v2944_v4  ;;  %v2241_v4 = vunpack.c.h.bf16 %v2255_v34 }
 0x2d5   : > { %1816 = vst.msk [vmem:[%s2984_s11 + $0x50] sm:$0xff] %vm1805_vm3, %v1797_v36 }
 0x2d8   : > { %v1744_v44 = vpop.permute.xlu2 %1743 }
 0x2d9   : > { %v1783_v54 = vmul.f32 %v2244_v41, %v1744_v44 }
 0x2db   : > { %v1801_v26 = vadd.f32 %v1783_v54, %v2966_v29  ;;  %v2249_v29 = vunpack.c.h.bf16 %v2257_v55 }
 0x2dd   : > { %1820 = vst.msk [vmem:[%s2984_s11 + $0x70] sm:$0xff] %vm1805_vm3, %v1801_v26 }
 0x2e0   : > { %v1740_v46 = vpop.permute.xlu0 %1739 }
 0x2e1   : > { %v1781_v9 = vmul.f32 %v2240_v24, %v1740_v46 }
 0x2e3   : > { %v1799_v47 = vadd.f32 %v1781_v9, %v2954_v15  ;;  %v2245_v15 = vunpack.c.h.bf16 %v2256_v37 }
 0x2e5   : > { %1818 = vst.msk [vmem:[%s2984_s11 + $0x60] sm:$0xff] %vm1805_vm3, %v1799_v47 }
 0x2e8   : > { %v1742_v3 = vpop.permute.xlu1 %1741 }
 0x2e9   : > { %v1782_v39 = vmul.f32 %v2241_v4, %v1742_v3 }
 0x2eb   : > { %v1800_v6 = vadd.f32 %v1782_v39, %v2960_v31 }
 0x2ed   : > { %1819 = vst.msk [vmem:[%s2984_s11 + $0x68] sm:$0xff] %vm1805_vm3, %v1800_v6 }
 0x2f0   : > { %v1750_v16 = vpop.permute.xlu2 %1749 }
 0x2f1   : > { %v1786_v50 = vmul.f32 %v2249_v29, %v1750_v16 }
 0x2f3   : > { %v1804_v62 = vadd.f32 %v1786_v50, %v2999_v7 }
 0x2f5   : > { %1823 = vst.msk [vmem:[%s2984_s11 + $0x88] sm:$0xff] %vm1805_vm3, %v1804_v62 }
 0x2f8   : > { %v1746_v60 = vpop.permute.xlu0 %1745 }
 0x2f9   : > { %v1784_v1 = vmul.f32 %v2245_v15, %v1746_v60 }
 0x2fb   : > { %v1802_v22 = vadd.f32 %v1784_v1, %v2977_v12 }
 0x2fd   : > { %1821 = vst.msk [vmem:[%s2984_s11 + $0x78] sm:$0xff] %vm1805_vm3, %v1802_v22 }
 0x300   : > { %v1748_v56 = vpop.permute.xlu1 %1747 }
 0x301   : > { %v1785_v31 = vmul.f32 %v2248_v58, %v1748_v56 }
 0x303   : > { %v1803_v61 = vadd.f32 %v1785_v31, %v2989_v40 }
 0x305   : > { %1822 = vst.msk [vmem:[%s2984_s11 + $0x80] sm:$0xff] %vm1805_vm3, %v1803_v61 }
 0x306 PF: > { %s16_s25 = sadd.s32 1, %s2379_s25   ;;  %s3081_s21 = smov %s2371_s23 }
 0x307   : > { %p13_p7 = scmp.ge.s32.totalorder %s16_s25, 6   ;;  %s3082_s22 = smov %s2375_s24 }
 0x308   : > { %s3083_s23 = smov %s3086_s26  ;;  %s3084_s24 = smov %s3090_s27 }
 0x309   :  { %15 = sbr.rel (!%p13_p7) target bundleno = 3 (0x3), region = 94 }

</bundles_post_ra>
